<compile_context>
chip_gen: v5e
topology: v5e:2x2
jax: 0.10.0
libtpu: 0.0.40
codegen_flags: <defaults>
</compile_context>

<pallas_src>
import functools
import math

import jax
import jax.numpy as jnp
from jax.experimental import pallas as pl
from jax.experimental.pallas import tpu as pltpu


# ----------------------------------------------------------------------------
# Pallas kernel: fused prefix projector
#   grid = (n_projectors, batch_blocks, O_tiles)  ("parallel","parallel","arbitrary")
# ----------------------------------------------------------------------------
def _fused_prefix_kernel(amr_ref,    # (Bt, S, D)   bf16  AMR encoder states
                         bias_ref,   # (Bt, 1, S)   f32   additive mask bias
                         q_ref,      # (1, P, D)    bf16  hoisted q = emb @ wq
                         wkv_ref,    # (1, D, 2D)   bf16  [wk | wv]
                         w1_ref,     # (1, D, M)    bf16
                         b1_ref,     # (1, 1, M)    f32
                         w2_ref,     # (1, M, tN)   bf16
                         b2_ref,     # (1, 1, tN)   f32
                         out_ref,    # (1, Bt, P, tN) f32
                         h_ref):     # (Bt, P, M)   f32 VMEM scratch (cached across O tiles)
    j = pl.program_id(2)                       # O-tile index (innermost, "arbitrary")
    Bt, S, D = amr_ref.shape
    P = q_ref.shape[1]
    M = w1_ref.shape[2]
    tN = w2_ref.shape[2]

    @pl.when(j == 0)
    def _():
        # ---- k/v projection: one fused MXU call over all Bt*S rows ---------
        amr = amr_ref[...]                                        # (Bt,S,D) bf16
        kv = jnp.dot(amr.reshape(Bt * S, D), wkv_ref[0],
                     preferred_element_type=jnp.float32)          # (Bt*S, 2D) f32
        kv = kv.reshape(Bt, S, 2 * D)
        k_b = kv[:, :, :D].astype(jnp.bfloat16)                   # (Bt,S,D)
        v_b = kv[:, :, D:].astype(jnp.bfloat16)                   # (Bt,S,D)

        # ---- cross-attention: prefix tokens attend over AMR states ---------
        q = jnp.broadcast_to(q_ref[0], (Bt, P, D))                # bf16
        scale = 1.0 / math.sqrt(float(D))
        scores = jnp.einsum("bpd,bsd->bps", q, k_b,
                            preferred_element_type=jnp.float32) * scale   # (Bt,P,S) f32
        scores = scores + bias_ref[...]                           # additive mask bias

        m = jnp.max(scores, axis=-1, keepdims=True)
        e = jnp.exp(scores - m)
        denom = jnp.sum(e, axis=-1, keepdims=True)
        attn = (e * pl.reciprocal(denom, approx=True)).astype(jnp.bfloat16)

        ctx = jnp.einsum("bps,bsd->bpd", attn, v_b,
                         preferred_element_type=jnp.float32)      # (Bt,P,D) f32

        # ---- first MLP layer (cached across O tiles) ------------------------
        pre = jnp.dot(ctx.reshape(Bt * P, D).astype(jnp.bfloat16), w1_ref[0],
                      preferred_element_type=jnp.float32) + b1_ref[0]      # (Bt*P,M) f32
        h_ref[...] = jnp.tanh(pre).reshape(Bt, P, M)

    # ---- second MLP layer for this O tile (every j) -------------------------
    h = h_ref[...].reshape(Bt * P, M).astype(jnp.bfloat16)
    out = jnp.dot(h, w2_ref[0], preferred_element_type=jnp.float32) + b2_ref[0]
    out_ref[0] = out.reshape(Bt, P, tN)


def _pick_block_b(batch):
    for cand in (8, 4, 2, 1):
        if batch % cand == 0:
            return cand
    return 1


def _pick_block_o(out_dim):
    if out_dim % 128 != 0 or out_dim <= 2048:
        return out_dim
    t = 2048
    while t > 128 and out_dim % t != 0:
        t -= 128
    return t if out_dim % t == 0 else out_dim


@functools.lru_cache(maxsize=None)
def _build_fused_call(N, B, S, D, P, M, O, Bt, tN,
                      single_buffer_weights, vmem_limit_bytes):
    grid = (N, B // Bt, O // tN)

    def wspec(shape, imap):
        # grid-constant-ish weights: single buffer to halve resident VMEM.
        if single_buffer_weights:
            return pl.BlockSpec(shape, imap, pipeline_mode=pl.Buffered(1))
        return pl.BlockSpec(shape, imap)

    in_specs = [
        pl.BlockSpec((Bt, S, D), lambda p, b, j: (b, 0, 0)),      # amr (bf16)
        pl.BlockSpec((Bt, 1, S), lambda p, b, j: (b, 0, 0)),      # mask bias (f32)
        wspec((1, P, D),         lambda p, b, j: (p, 0, 0)),      # q
        wspec((1, D, 2 * D),     lambda p, b, j: (p, 0, 0)),      # wkv
        wspec((1, D, M),         lambda p, b, j: (p, 0, 0)),      # w1
        wspec((1, 1, M),         lambda p, b, j: (p, 0, 0)),      # b1
        pl.BlockSpec((1, M, tN), lambda p, b, j: (p, 0, j)),      # w2 (O-tiled)
        pl.BlockSpec((1, 1, tN), lambda p, b, j: (p, 0, j)),      # b2 (O-tiled)
    ]
    out_specs = pl.BlockSpec((1, Bt, P, tN), lambda p, b, j: (p, b, 0, j))

    return pl.pallas_call(
        _fused_prefix_kernel,
        out_shape=jax.ShapeDtypeStruct((N, B, P, O), jnp.float32),
        grid_spec=pltpu.PrefetchScalarGridSpec(
            num_scalar_prefetch=0,
            grid=grid,
            in_specs=in_specs,
            out_specs=out_specs,
            scratch_shapes=[pltpu.VMEM((Bt, P, M), jnp.float32)]),
        compiler_params=pltpu.CompilerParams(
            dimension_semantics=("parallel", "parallel", "arbitrary"),
            vmem_limit_bytes=vmem_limit_bytes),
    )


# Probe result for pipeline_mode=pl.Buffered(1) support (None = not probed yet).
_SINGLE_BUFFER_OK = None


def fused_prefix_projector(amr_emb, bias, q_all, wkv, w1, b1, w2, b2,
                           *, block_b=None, block_o=None, vmem_limit_bytes=None):
    """One pallas_call computing all projectors.

    amr_emb : (B, S, D)    bf16   AMR encoder states
    bias    : (B, 1, S)    f32    additive attention-mask bias ((mask-1)*1e9)
    q_all   : (N, P, D)    bf16   hoisted q = prefix_emb @ wq, per projector
    wkv     : (N, D, 2D)   bf16   [wk | wv]
    w1      : (N, D, M)    bf16
    b1      : (N, 1, M)    f32
    w2      : (N, M, O)    bf16
    b2      : (N, 1, O)    f32
    returns : (N, B, P, O) f32
    """
    global _SINGLE_BUFFER_OK
    B, S, D = amr_emb.shape
    N, P, _ = q_all.shape
    M = w1.shape[-1]
    O = w2.shape[-1]

    Bt = _pick_block_b(B) if block_b is None else block_b
    tN = _pick_block_o(O) if block_o is None else block_o
    assert B % Bt == 0 and O % tN == 0
    assert tN == O or tN % 128 == 0

    args = (amr_emb, bias, q_all, wkv, w1, b1, w2, b2)
    key = (N, B, S, D, P, M, O, Bt, tN)

    if _SINGLE_BUFFER_OK is None:
        try:
            out = _build_fused_call(*key, True, vmem_limit_bytes)(*args)
            _SINGLE_BUFFER_OK = True
            return out
        except Exception:
            # Fallback if this jax/libtpu combination rejects pl.Buffered(1).
            _SINGLE_BUFFER_OK = False
    return _build_fused_call(*key, _SINGLE_BUFFER_OK, vmem_limit_bytes)(*args)


# ----------------------------------------------------------------------------
# JAX reference (mirrors the kernel's bf16 operand casts when requested)
# ----------------------------------------------------------------------------
def prefix_projector_ref(amr_emb, amr_mask, prefix_emb, params,
                         *, match_kernel_precision=True):
    cast = (lambda x: x.astype(jnp.bfloat16)) if match_kernel_precision else (lambda x: x)
    D = amr_emb.shape[-1]
    scale = 1.0 / math.sqrt(float(D))

    q = cast(prefix_emb @ params["wq"])                                     # (P, D)
    wkv = cast(jnp.concatenate([params["wk"], params["wv"]], axis=-1))       # (D, 2D)
    kv = jnp.einsum("bsd,de->bse", cast(amr_emb), wkv,
                    preferred_element_type=jnp.float32)                      # (B, S, 2D)
    k = cast(kv[..., :D])
    v = cast(kv[..., D:])

    scores = jnp.einsum("pd,bsd->bps", q, k,
                        preferred_element_type=jnp.float32) * scale
    scores = scores + ((amr_mask - 1.0) * 1e9)[:, None, :]
    m = jnp.max(scores, axis=-1, keepdims=True)
    e = jnp.exp(scores - m)
    attn = e / jnp.sum(e, axis=-1, keepdims=True)

    ctx = jnp.einsum("bps,bsd->bpd", cast(attn), v,
                     preferred_element_type=jnp.float32)
    h = jnp.tanh(jnp.einsum("bpd,dm->bpm", cast(ctx), cast(params["w1"]),
                            preferred_element_type=jnp.float32) + params["b1"])
    return jnp.einsum("bpm,mo->bpo", cast(h), cast(params["w2"]),
                      preferred_element_type=jnp.float32) + params["b2"]


# ----------------------------------------------------------------------------
# "Module": deterministic parameter init + get_prefix
# ----------------------------------------------------------------------------
def init_projector_params(key, d_model, d_mid, d_out):
    ks = jax.random.split(key, 7)
    s = 0.02
    return {
        "wq": s * jax.random.normal(ks[0], (d_model, d_model), jnp.float32),
        "wk": s * jax.random.normal(ks[1], (d_model, d_model), jnp.float32),
        "wv": s * jax.random.normal(ks[2], (d_model, d_model), jnp.float32),
        "w1": s * jax.random.normal(ks[3], (d_model, d_mid), jnp.float32),
        "b1": s * jax.random.normal(ks[4], (1, d_mid), jnp.float32),
        "w2": s * jax.random.normal(ks[5], (d_mid, d_out), jnp.float32),
        "b2": s * jax.random.normal(ks[6], (1, d_out), jnp.float32),
    }


class AMRPrefixGenBasePallas:
    """Pallas port of AMRPrefixGenBase.get_prefix (the module's own compute)."""

    def __init__(self, *, vocab_size, prefix_length, d_model, d_mid,
                 n_layers, n_head, head_dim,
                 use_encoder_prefix=True, use_cross_prefix=True,
                 use_decoder_prefix=True, seed=0):
        self.prefix_length = prefix_length
        self.d_model = d_model
        self.n_layers = n_layers
        self.n_head = n_head
        self.head_dim = head_dim

        key = jax.random.PRNGKey(seed)
        k_wte, k_enc, k_cross, k_dec = jax.random.split(key, 4)
        # nn.Embedding(prefix_length_vocab, d_model) — only rows 0..P-1 used.
        self.wte = 0.02 * jax.random.normal(
            k_wte, (vocab_size, d_model), jnp.float32)

        d_out = 2 * n_layers * n_head * head_dim
        self.enc_proj = init_projector_params(k_enc, d_model, d_mid, d_out)
        self.cross_proj = init_projector_params(k_cross, d_model, d_mid, d_out)
        self.dec_proj = init_projector_params(k_dec, d_model, d_mid, d_out)

        names, dicts = [], []
        if use_encoder_prefix:
            names.append("encoder_prefix"); dicts.append(self.enc_proj)
        if use_cross_prefix:
            names.append("cross_prefix"); dicts.append(self.cross_proj)
        if use_decoder_prefix:
            names.append("decoder_prefix"); dicts.append(self.dec_proj)
        self.prefix_names = names

        if dicts:
            stack = lambda k: jnp.stack([d[k] for d in dicts], axis=0)
            self._wq = stack("wq")                                               # (N,D,D) f32
            self._wkv = jnp.concatenate([stack("wk"), stack("wv")],
                                        axis=-1).astype(jnp.bfloat16)            # (N,D,2D)
            self._w1 = stack("w1").astype(jnp.bfloat16)                          # (N,D,M)
            self._b1 = stack("b1")                                               # (N,1,M) f32
            self._w2 = stack("w2").astype(jnp.bfloat16)                          # (N,M,O)
            self._b2 = stack("b2")                                               # (N,1,O) f32

    def get_prefix(self, amr_embedding, amr_mask):
        if not self.prefix_names:
            return {}
        B, S, _ = amr_embedding.shape
        P, L, H, Dh = (self.prefix_length, self.n_layers,
                       self.n_head, self.head_dim)
        N = len(self.prefix_names)

        # input_tokens = arange(prefix_length) expanded to batch; the wte
        # lookup is a contiguous-row gather -> plain slice (glue).
        input_embeds = self.wte[:P]                                          # (P, D)
        # Batch-invariant q projection hoisted out of the kernel grid (tiny).
        q_all = jnp.einsum("pd,nde->npe", input_embeds,
                           self._wq).astype(jnp.bfloat16)                    # (N, P, D)
        # Additive attention-mask bias precomputed once.
        bias = ((amr_mask - 1.0) * 1e9).astype(jnp.float32).reshape(B, 1, S)

        out = fused_prefix_projector(
            amr_embedding.astype(jnp.bfloat16), bias, q_all,
            self._wkv, self._w1, self._b1, self._w2, self._b2)               # (N,B,P,O)

        # One reshape + one transpose for all projectors and key/value.
        out = out.reshape(N, B, P, 2, L, H, Dh)
        out = jnp.transpose(out, (0, 3, 4, 1, 5, 2, 6))                      # (N,2,L,B,H,P,Dh)
        prefix = {}
        for i, name in enumerate(self.prefix_names):
            prefix[name] = (out[i, 0], out[i, 1])
        return prefix

    # TODO(synk): forward()/process_data()/generate() depend on an external
    # HuggingFace tokenizer, a pretrained prefix-BART (self.model) and an AMR
    # encoder (self.AMR_model); those pretrained networks are outside the scope
    # of this kernel and are not reproduced here.


# ----------------------------------------------------------------------------
if __name__ == "__main__":
    # Small shapes implied by the module: batch=2, AMR seq=16, hidden=32,
    # prefix_length=8, 2 layers x 4 heads x 8 head_dim (O = 2*2*4*8 = 128).
    B, S, D = 2, 16, 32
    P, MID = 8, 64
    L, H, Dh = 2, 4, 8

    module = AMRPrefixGenBasePallas(
        vocab_size=P, prefix_length=P, d_model=D, d_mid=MID,
        n_layers=L, n_head=H, head_dim=Dh, seed=0)

    key = jax.random.PRNGKey(0)
    k_amr, _ = jax.random.split(key)
    # Synthetic AMR encoder output (stands in for AMR_model.get_encoder_output)
    amr_embedding = jax.random.normal(k_amr, (B, S, D), jnp.float32)
    # AMR attention mask: second example padded at the tail.
    amr_mask = jnp.concatenate(
        [jnp.ones((1, S), jnp.float32),
         jnp.concatenate([jnp.ones((1, S - 4), jnp.float32),
                          jnp.zeros((1, 4), jnp.float32)], axis=1)], axis=0)

    prefix = module.get_prefix(amr_embedding, amr_mask)
    jax.block_until_ready(prefix)

    # Correctness: compare kernel output against JAX references.
    param_map = {"encoder_prefix": module.enc_proj,
                 "cross_prefix": module.cross_proj,
                 "decoder_prefix": module.dec_proj}
    input_embeds = module.wte[:P]
    ok = True
    for name in module.prefix_names:
        params = param_map[name]
        got_key, got_val = prefix[name]
        # (a) precision-matched reference (bf16 MXU operands), tight tolerance
        # (b) pure-f32 reference, loose tolerance (bf16 cast error budget)
        for match, atol, rtol in ((True, 2e-4, 2e-3), (False, 5e-3, 5e-2)):
            ref = prefix_projector_ref(amr_embedding, amr_mask, input_embeds,
                                       params, match_kernel_precision=match)
            ref = ref.reshape(B, P, 2, L, H, Dh)
            ref_key = jnp.transpose(ref[:, :, 0], (2, 0, 3, 1, 4))
            ref_val = jnp.transpose(ref[:, :, 1], (2, 0, 3, 1, 4))
            ok &= bool(jnp.allclose(got_key, ref_key, atol=atol, rtol=rtol))
            ok &= bool(jnp.allclose(got_val, ref_val, atol=atol, rtol=rtol))

    assert ok, "Pallas kernel does not match JAX reference"
    print("KERNEL_OK")
</pallas_src>

<mosaic_0001>
module attributes {stable_mosaic.version = 11 : i64} {
  func.func @_fused_prefix_kernel(%arg0: i32, %arg1: i32, %arg2: i32, %arg3: memref<2x16x32xbf16, #tpu.memory_space<vmem>>, %arg4: memref<2x1x16xf32, #tpu.memory_space<vmem>>, %arg5: memref<1x8x32xbf16, #tpu.memory_space<vmem>>, %arg6: memref<1x32x64xbf16, #tpu.memory_space<vmem>>, %arg7: memref<1x32x64xbf16, #tpu.memory_space<vmem>>, %arg8: memref<1x1x64xf32, #tpu.memory_space<vmem>>, %arg9: memref<1x64x128xbf16, #tpu.memory_space<vmem>>, %arg10: memref<1x1x128xf32, #tpu.memory_space<vmem>>, %arg11: memref<1x2x8x128xf32, #tpu.memory_space<vmem>>, %arg12: memref<2x8x64xf32, #tpu.memory_space<vmem>>) attributes {dimension_semantics = [#tpu.dimension_semantics<parallel>, #tpu.dimension_semantics<parallel>, #tpu.dimension_semantics<arbitrary>], iteration_bounds = array<i64: 3, 1, 1>, scalar_prefetch = 0 : i64, scratch_operands = 1 : i64, tpu.core_type = #tpu.core_type<tc>, window_params = [{transform_indices = @transform_0, window_bounds = array<i64: 2, 16, 32>}, {transform_indices = @transform_1, window_bounds = array<i64: 2, 1, 16>}, {pipeline_mode = #tpu.pipeline_mode<synchronous>, transform_indices = @transform_2, window_bounds = array<i64: 1, 8, 32>}, {pipeline_mode = #tpu.pipeline_mode<synchronous>, transform_indices = @transform_3, window_bounds = array<i64: 1, 32, 64>}, {pipeline_mode = #tpu.pipeline_mode<synchronous>, transform_indices = @transform_4, window_bounds = array<i64: 1, 32, 64>}, {pipeline_mode = #tpu.pipeline_mode<synchronous>, transform_indices = @transform_5, window_bounds = array<i64: 1, 1, 64>}, {transform_indices = @transform_6, window_bounds = array<i64: 1, 64, 128>}, {transform_indices = @transform_7, window_bounds = array<i64: 1, 1, 128>}, {transform_indices = @transform_8, window_bounds = array<i64: 1, 2, 8, 128>}]} {
    %c0_i32 = arith.constant 0 : i32
    %0 = arith.cmpi eq, %arg2, %c0_i32 : i32
    %1 = arith.extui %0 : i1 to i32
    %c0_i32_0 = arith.constant 0 : i32
    %2 = arith.cmpi ne, %1, %c0_i32_0 : i32
    scf.if %2 {
      %c0_13 = arith.constant 0 : index
      %c0_14 = arith.constant 0 : index
      %c0_15 = arith.constant 0 : index
      %17 = vector.load %arg3[%c0_13, %c0_14, %c0_15] : memref<2x16x32xbf16, #tpu.memory_space<vmem>>, vector<2x16x32xbf16>
      %18 = vector.shape_cast %17 : vector<2x16x32xbf16> to vector<32x32xbf16>
      %c0_16 = arith.constant 0 : index
      %c0_17 = arith.constant 0 : index
      %c0_18 = arith.constant 0 : index
      %19 = vector.load %arg6[%c0_16, %c0_17, %c0_18] : memref<1x32x64xbf16, #tpu.memory_space<vmem>>, vector<1x32x64xbf16>
      %20 = vector.shape_cast %19 : vector<1x32x64xbf16> to vector<32x64xbf16>
      %cst_19 = arith.constant dense<0.000000e+00> : vector<32x64xf32>
      %21 = tpu.matmul %18, %20, %cst_19 {dimension_numbers = #tpu.dot_dimension_numbers<[1], [0], [0], [1], [0, 0, 1, 1], [], []>} : vector<32x32xbf16>, vector<32x64xbf16>, vector<32x64xf32> -> vector<32x64xf32>
      %22 = vector.shape_cast %21 : vector<32x64xf32> to vector<2x16x64xf32>
      %23 = vector.extract_strided_slice %22 {offsets = [0, 0, 0], sizes = [2, 16, 32], strides = [1, 1, 1]} : vector<2x16x64xf32> to vector<2x16x32xf32>
      %24 = arith.truncf %23 : vector<2x16x32xf32> to vector<2x16x32xbf16>
      %25 = vector.extract_strided_slice %22 {offsets = [0, 0, 32], sizes = [2, 16, 32], strides = [1, 1, 1]} : vector<2x16x64xf32> to vector<2x16x32xf32>
      %26 = arith.truncf %25 : vector<2x16x32xf32> to vector<2x16x32xbf16>
      %c0_20 = arith.constant 0 : index
      %c0_21 = arith.constant 0 : index
      %c0_22 = arith.constant 0 : index
      %27 = vector.load %arg5[%c0_20, %c0_21, %c0_22] : memref<1x8x32xbf16, #tpu.memory_space<vmem>>, vector<1x8x32xbf16>
      %28 = vector.shape_cast %27 : vector<1x8x32xbf16> to vector<8x32xbf16>
      %29 = vector.shape_cast %28 : vector<8x32xbf16> to vector<1x8x32xbf16>
      %30 = vector.broadcast %29 : vector<1x8x32xbf16> to vector<2x8x32xbf16>
      "tpu.trace_start"() <{level = 10 : i32, message = "bpd,bsd->bps"}> : () -> ()
      %cst_23 = arith.constant dense<0.000000e+00> : vector<2x8x16xf32>
      %31 = tpu.matmul %30, %24, %cst_23 {dimension_numbers = #tpu.dot_dimension_numbers<[2], [2], [1], [1], [0, 0, 0, 1, 1, 1], [0], [0]>} : vector<2x8x32xbf16>, vector<2x16x32xbf16>, vector<2x8x16xf32> -> vector<2x8x16xf32>
      "tpu.trace_stop"() : () -> ()
      %cst_24 = arith.constant 0.176776692 : f32
      %32 = vector.broadcast %cst_24 : f32 to vector<2x8x16xf32>
      %33 = arith.mulf %31, %32 : vector<2x8x16xf32>
      %c0_25 = arith.constant 0 : index
      %c0_26 = arith.constant 0 : index
      %c0_27 = arith.constant 0 : index
      %34 = vector.load %arg4[%c0_25, %c0_26, %c0_27] : memref<2x1x16xf32, #tpu.memory_space<vmem>>, vector<2x1x16xf32>
      %35 = vector.broadcast %34 : vector<2x1x16xf32> to vector<2x8x16xf32>
      %36 = arith.addf %33, %35 : vector<2x8x16xf32>
      %cst_28 = arith.constant dense<0xFF800000> : vector<2x8xf32>
      %37 = vector.multi_reduction <maximumf>, %36, %cst_28 [2] : vector<2x8x16xf32> to vector<2x8xf32>
      %38 = vector.shape_cast %37 : vector<2x8xf32> to vector<2x8x1xf32>
      %39 = vector.broadcast %38 : vector<2x8x1xf32> to vector<2x8x16xf32>
      %40 = arith.subf %36, %39 : vector<2x8x16xf32>
      %41 = math.exp %40 : vector<2x8x16xf32>
      %cst_29 = arith.constant dense<0.000000e+00> : vector<2x8xf32>
      %42 = vector.multi_reduction <add>, %41, %cst_29 [2] : vector<2x8x16xf32> to vector<2x8xf32>
      %43 = vector.shape_cast %42 : vector<2x8xf32> to vector<2x8x1xf32>
      %44 = tpu.reciprocal %43 {approx = true} : vector<2x8x1xf32> -> vector<2x8x1xf32>
      %45 = vector.broadcast %44 : vector<2x8x1xf32> to vector<2x8x16xf32>
      %46 = arith.mulf %41, %45 : vector<2x8x16xf32>
      %47 = arith.truncf %46 : vector<2x8x16xf32> to vector<2x8x16xbf16>
      "tpu.trace_start"() <{level = 10 : i32, message = "bps,bsd->bpd"}> : () -> ()
      %cst_30 = arith.constant dense<0.000000e+00> : vector<2x8x32xf32>
      %48 = tpu.matmul %47, %26, %cst_30 {dimension_numbers = #tpu.dot_dimension_numbers<[2], [1], [1], [2], [0, 0, 0, 1, 1, 2], [0], [0]>} : vector<2x8x16xbf16>, vector<2x16x32xbf16>, vector<2x8x32xf32> -> vector<2x8x32xf32>
      "tpu.trace_stop"() : () -> ()
      %49 = vector.shape_cast %48 : vector<2x8x32xf32> to vector<16x32xf32>
      %50 = arith.truncf %49 : vector<16x32xf32> to vector<16x32xbf16>
      %c0_31 = arith.constant 0 : index
      %c0_32 = arith.constant 0 : index
      %c0_33 = arith.constant 0 : index
      %51 = vector.load %arg7[%c0_31, %c0_32, %c0_33] : memref<1x32x64xbf16, #tpu.memory_space<vmem>>, vector<1x32x64xbf16>
      %52 = vector.shape_cast %51 : vector<1x32x64xbf16> to vector<32x64xbf16>
      %cst_34 = arith.constant dense<0.000000e+00> : vector<16x64xf32>
      %53 = tpu.matmul %50, %52, %cst_34 {dimension_numbers = #tpu.dot_dimension_numbers<[1], [0], [0], [1], [0, 0, 1, 1], [], []>} : vector<16x32xbf16>, vector<32x64xbf16>, vector<16x64xf32> -> vector<16x64xf32>
      %c0_35 = arith.constant 0 : index
      %c0_36 = arith.constant 0 : index
      %c0_37 = arith.constant 0 : index
      %54 = vector.load %arg8[%c0_35, %c0_36, %c0_37] : memref<1x1x64xf32, #tpu.memory_space<vmem>>, vector<1x1x64xf32>
      %55 = vector.shape_cast %54 : vector<1x1x64xf32> to vector<1x64xf32>
      %56 = vector.broadcast %55 : vector<1x64xf32> to vector<16x64xf32>
      %57 = arith.addf %53, %56 : vector<16x64xf32>
      %58 = math.tanh %57 : vector<16x64xf32>
      %59 = vector.shape_cast %58 : vector<16x64xf32> to vector<2x8x64xf32>
      %c0_38 = arith.constant 0 : index
      %c0_39 = arith.constant 0 : index
      %c0_40 = arith.constant 0 : index
      %60 = vector.load %arg12[%c0_38, %c0_39, %c0_40] : memref<2x8x64xf32, #tpu.memory_space<vmem>>, vector<2x8x64xf32>
      tpu.vector_store %arg12[%c0_38, %c0_39, %c0_40], %59 {strides = array<i32>} : memref<2x8x64xf32, #tpu.memory_space<vmem>>, vector<2x8x64xf32>,
    } else {
    }
    %c0 = arith.constant 0 : index
    %c0_1 = arith.constant 0 : index
    %c0_2 = arith.constant 0 : index
    %3 = vector.load %arg12[%c0, %c0_1, %c0_2] : memref<2x8x64xf32, #tpu.memory_space<vmem>>, vector<2x8x64xf32>
    %4 = vector.shape_cast %3 : vector<2x8x64xf32> to vector<16x64xf32>
    %5 = arith.truncf %4 : vector<16x64xf32> to vector<16x64xbf16>
    %c0_3 = arith.constant 0 : index
    %c0_4 = arith.constant 0 : index
    %c0_5 = arith.constant 0 : index
    %6 = vector.load %arg9[%c0_3, %c0_4, %c0_5] : memref<1x64x128xbf16, #tpu.memory_space<vmem>>, vector<1x64x128xbf16>
    %7 = vector.shape_cast %6 : vector<1x64x128xbf16> to vector<64x128xbf16>
    %cst = arith.constant dense<0.000000e+00> : vector<16x128xf32>
    %8 = tpu.matmul %5, %7, %cst {dimension_numbers = #tpu.dot_dimension_numbers<[1], [0], [0], [1], [0, 0, 1, 1], [], []>} : vector<16x64xbf16>, vector<64x128xbf16>, vector<16x128xf32> -> vector<16x128xf32>
    %c0_6 = arith.constant 0 : index
    %c0_7 = arith.constant 0 : index
    %c0_8 = arith.constant 0 : index
    %9 = vector.load %arg10[%c0_6, %c0_7, %c0_8] : memref<1x1x128xf32, #tpu.memory_space<vmem>>, vector<1x1x128xf32>
    %10 = vector.shape_cast %9 : vector<1x1x128xf32> to vector<1x128xf32>
    %11 = vector.broadcast %10 : vector<1x128xf32> to vector<16x128xf32>
    %12 = arith.addf %8, %11 : vector<16x128xf32>
    %13 = vector.shape_cast %12 : vector<16x128xf32> to vector<2x8x128xf32>
    %c0_9 = arith.constant 0 : index
    %c0_10 = arith.constant 0 : index
    %c0_11 = arith.constant 0 : index
    %c0_12 = arith.constant 0 : index
    %14 = vector.load %arg11[%c0_9, %c0_10, %c0_11, %c0_12] : memref<1x2x8x128xf32, #tpu.memory_space<vmem>>, vector<1x2x8x128xf32>
    %15 = vector.shape_cast %14 : vector<1x2x8x128xf32> to vector<2x8x128xf32>
    %16 = vector.shape_cast %13 : vector<2x8x128xf32> to vector<1x2x8x128xf32>
    tpu.vector_store %arg11[%c0_9, %c0_10, %c0_11, %c0_12], %16 {strides = array<i32>} : memref<1x2x8x128xf32, #tpu.memory_space<vmem>>, vector<1x2x8x128xf32>,
    return
  }
  func.func @transform_0(%arg0: i32, %arg1: i32, %arg2: i32) -> (i32, i32, i32) {
    %c0_i32 = arith.constant 0 : i32
    %c0_i32_0 = arith.constant 0 : i32
    %c0_i32_1 = arith.constant 0 : i32
    return %arg1, %c0_i32, %c0_i32_0 : i32, i32, i32
  }
  func.func @transform_1(%arg0: i32, %arg1: i32, %arg2: i32) -> (i32, i32, i32) {
    %c0_i32 = arith.constant 0 : i32
    %c0_i32_0 = arith.constant 0 : i32
    %c0_i32_1 = arith.constant 0 : i32
    return %arg1, %c0_i32, %c0_i32_0 : i32, i32, i32
  }
  func.func @transform_2(%arg0: i32, %arg1: i32, %arg2: i32) -> (i32, i32, i32) {
    %c0_i32 = arith.constant 0 : i32
    %c0_i32_0 = arith.constant 0 : i32
    %c0_i32_1 = arith.constant 0 : i32
    return %arg0, %c0_i32, %c0_i32_0 : i32, i32, i32
  }
  func.func @transform_3(%arg0: i32, %arg1: i32, %arg2: i32) -> (i32, i32, i32) {
    %c0_i32 = arith.constant 0 : i32
    %c0_i32_0 = arith.constant 0 : i32
    %c0_i32_1 = arith.constant 0 : i32
    return %arg0, %c0_i32, %c0_i32_0 : i32, i32, i32
  }
  func.func @transform_4(%arg0: i32, %arg1: i32, %arg2: i32) -> (i32, i32, i32) {
    %c0_i32 = arith.constant 0 : i32
    %c0_i32_0 = arith.constant 0 : i32
    %c0_i32_1 = arith.constant 0 : i32
    return %arg0, %c0_i32, %c0_i32_0 : i32, i32, i32
  }
  func.func @transform_5(%arg0: i32, %arg1: i32, %arg2: i32) -> (i32, i32, i32) {
    %c0_i32 = arith.constant 0 : i32
    %c0_i32_0 = arith.constant 0 : i32
    %c0_i32_1 = arith.constant 0 : i32
    return %arg0, %c0_i32, %c0_i32_0 : i32, i32, i32
  }
  func.func @transform_6(%arg0: i32, %arg1: i32, %arg2: i32) -> (i32, i32, i32) {
    %c0_i32 = arith.constant 0 : i32
    %c0_i32_0 = arith.constant 0 : i32
    return %arg0, %c0_i32, %arg2 : i32, i32, i32
  }
  func.func @transform_7(%arg0: i32, %arg1: i32, %arg2: i32) -> (i32, i32, i32) {
    %c0_i32 = arith.constant 0 : i32
    %c0_i32_0 = arith.constant 0 : i32
    return %arg0, %c0_i32, %arg2 : i32, i32, i32
  }
  func.func @transform_8(%arg0: i32, %arg1: i32, %arg2: i32) -> (i32, i32, i32, i32) {
    %c0_i32 = arith.constant 0 : i32
    %c0_i32_0 = arith.constant 0 : i32
    return %arg0, %arg1, %c0_i32, %arg2 : i32, i32, i32, i32
  }
}

module attributes {stable_mosaic.version = 11 : i64} {
  func.func @_fused_prefix_kernel(%arg0: i32, %arg1: i32, %arg2: i32, %arg3: memref<2x16x32xbf16, #tpu.memory_space<vmem>>, %arg4: memref<2x1x16xf32, #tpu.memory_space<vmem>>, %arg5: memref<1x8x32xbf16, #tpu.memory_space<vmem>>, %arg6: memref<1x32x64xbf16, #tpu.memory_space<vmem>>, %arg7: memref<1x32x64xbf16, #tpu.memory_space<vmem>>, %arg8: memref<1x1x64xf32, #tpu.memory_space<vmem>>, %arg9: memref<1x64x128xbf16, #tpu.memory_space<vmem>>, %arg10: memref<1x1x128xf32, #tpu.memory_space<vmem>>, %arg11: memref<1x2x8x128xf32, #tpu.memory_space<vmem>>, %arg12: memref<2x8x64xf32, #tpu.memory_space<vmem>>) attributes {dimension_semantics = [#tpu.dimension_semantics<parallel>, #tpu.dimension_semantics<parallel>, #tpu.dimension_semantics<arbitrary>], iteration_bounds = array<i64: 3, 1, 1>, scalar_prefetch = 0 : i64, scratch_operands = 1 : i64, tpu.core_type = #tpu.core_type<tc>, window_params = [{transform_indices = @transform_0, window_bounds = array<i64: 2, 16, 32>}, {transform_indices = @transform_1, window_bounds = array<i64: 2, 1, 16>}, {transform_indices = @transform_2, window_bounds = array<i64: 1, 8, 32>}, {transform_indices = @transform_3, window_bounds = array<i64: 1, 32, 64>}, {transform_indices = @transform_4, window_bounds = array<i64: 1, 32, 64>}, {transform_indices = @transform_5, window_bounds = array<i64: 1, 1, 64>}, {transform_indices = @transform_6, window_bounds = array<i64: 1, 64, 128>}, {transform_indices = @transform_7, window_bounds = array<i64: 1, 1, 128>}, {transform_indices = @transform_8, window_bounds = array<i64: 1, 2, 8, 128>}]} {
    %c0_i32 = arith.constant 0 : i32
    %0 = arith.cmpi eq, %arg2, %c0_i32 : i32
    %1 = arith.extui %0 : i1 to i32
    %c0_i32_0 = arith.constant 0 : i32
    %2 = arith.cmpi ne, %1, %c0_i32_0 : i32
    scf.if %2 {
      %c0_13 = arith.constant 0 : index
      %c0_14 = arith.constant 0 : index
      %c0_15 = arith.constant 0 : index
      %17 = vector.load %arg3[%c0_13, %c0_14, %c0_15] : memref<2x16x32xbf16, #tpu.memory_space<vmem>>, vector<2x16x32xbf16>
      %18 = vector.shape_cast %17 : vector<2x16x32xbf16> to vector<32x32xbf16>
      %c0_16 = arith.constant 0 : index
      %c0_17 = arith.constant 0 : index
      %c0_18 = arith.constant 0 : index
      %19 = vector.load %arg6[%c0_16, %c0_17, %c0_18] : memref<1x32x64xbf16, #tpu.memory_space<vmem>>, vector<1x32x64xbf16>
      %20 = vector.shape_cast %19 : vector<1x32x64xbf16> to vector<32x64xbf16>
      %cst_19 = arith.constant dense<0.000000e+00> : vector<32x64xf32>
      %21 = tpu.matmul %18, %20, %cst_19 {dimension_numbers = #tpu.dot_dimension_numbers<[1], [0], [0], [1], [0, 0, 1, 1], [], []>} : vector<32x32xbf16>, vector<32x64xbf16>, vector<32x64xf32> -> vector<32x64xf32>
      %22 = vector.shape_cast %21 : vector<32x64xf32> to vector<2x16x64xf32>
      %23 = vector.extract_strided_slice %22 {offsets = [0, 0, 0], sizes = [2, 16, 32], strides = [1, 1, 1]} : vector<2x16x64xf32> to vector<2x16x32xf32>
      %24 = arith.truncf %23 : vector<2x16x32xf32> to vector<2x16x32xbf16>
      %25 = vector.extract_strided_slice %22 {offsets = [0, 0, 32], sizes = [2, 16, 32], strides = [1, 1, 1]} : vector<2x16x64xf32> to vector<2x16x32xf32>
      %26 = arith.truncf %25 : vector<2x16x32xf32> to vector<2x16x32xbf16>
      %c0_20 = arith.constant 0 : index
      %c0_21 = arith.constant 0 : index
      %c0_22 = arith.constant 0 : index
      %27 = vector.load %arg5[%c0_20, %c0_21, %c0_22] : memref<1x8x32xbf16, #tpu.memory_space<vmem>>, vector<1x8x32xbf16>
      %28 = vector.shape_cast %27 : vector<1x8x32xbf16> to vector<8x32xbf16>
      %29 = vector.shape_cast %28 : vector<8x32xbf16> to vector<1x8x32xbf16>
      %30 = vector.broadcast %29 : vector<1x8x32xbf16> to vector<2x8x32xbf16>
      "tpu.trace_start"() <{level = 10 : i32, message = "bpd,bsd->bps"}> : () -> ()
      %cst_23 = arith.constant dense<0.000000e+00> : vector<2x8x16xf32>
      %31 = tpu.matmul %30, %24, %cst_23 {dimension_numbers = #tpu.dot_dimension_numbers<[2], [2], [1], [1], [0, 0, 0, 1, 1, 1], [0], [0]>} : vector<2x8x32xbf16>, vector<2x16x32xbf16>, vector<2x8x16xf32> -> vector<2x8x16xf32>
      "tpu.trace_stop"() : () -> ()
      %cst_24 = arith.constant 0.176776692 : f32
      %32 = vector.broadcast %cst_24 : f32 to vector<2x8x16xf32>
      %33 = arith.mulf %31, %32 : vector<2x8x16xf32>
      %c0_25 = arith.constant 0 : index
      %c0_26 = arith.constant 0 : index
      %c0_27 = arith.constant 0 : index
      %34 = vector.load %arg4[%c0_25, %c0_26, %c0_27] : memref<2x1x16xf32, #tpu.memory_space<vmem>>, vector<2x1x16xf32>
      %35 = vector.broadcast %34 : vector<2x1x16xf32> to vector<2x8x16xf32>
      %36 = arith.addf %33, %35 : vector<2x8x16xf32>
      %cst_28 = arith.constant dense<0xFF800000> : vector<2x8xf32>
      %37 = vector.multi_reduction <maximumf>, %36, %cst_28 [2] : vector<2x8x16xf32> to vector<2x8xf32>
      %38 = vector.shape_cast %37 : vector<2x8xf32> to vector<2x8x1xf32>
      %39 = vector.broadcast %38 : vector<2x8x1xf32> to vector<2x8x16xf32>
      %40 = arith.subf %36, %39 : vector<2x8x16xf32>
      %41 = math.exp %40 : vector<2x8x16xf32>
      %cst_29 = arith.constant dense<0.000000e+00> : vector<2x8xf32>
      %42 = vector.multi_reduction <add>, %41, %cst_29 [2] : vector<2x8x16xf32> to vector<2x8xf32>
      %43 = vector.shape_cast %42 : vector<2x8xf32> to vector<2x8x1xf32>
      %44 = tpu.reciprocal %43 {approx = true} : vector<2x8x1xf32> -> vector<2x8x1xf32>
      %45 = vector.broadcast %44 : vector<2x8x1xf32> to vector<2x8x16xf32>
      %46 = arith.mulf %41, %45 : vector<2x8x16xf32>
      %47 = arith.truncf %46 : vector<2x8x16xf32> to vector<2x8x16xbf16>
      "tpu.trace_start"() <{level = 10 : i32, message = "bps,bsd->bpd"}> : () -> ()
      %cst_30 = arith.constant dense<0.000000e+00> : vector<2x8x32xf32>
      %48 = tpu.matmul %47, %26, %cst_30 {dimension_numbers = #tpu.dot_dimension_numbers<[2], [1], [1], [2], [0, 0, 0, 1, 1, 2], [0], [0]>} : vector<2x8x16xbf16>, vector<2x16x32xbf16>, vector<2x8x32xf32> -> vector<2x8x32xf32>
      "tpu.trace_stop"() : () -> ()
      %49 = vector.shape_cast %48 : vector<2x8x32xf32> to vector<16x32xf32>
      %50 = arith.truncf %49 : vector<16x32xf32> to vector<16x32xbf16>
      %c0_31 = arith.constant 0 : index
      %c0_32 = arith.constant 0 : index
      %c0_33 = arith.constant 0 : index
      %51 = vector.load %arg7[%c0_31, %c0_32, %c0_33] : memref<1x32x64xbf16, #tpu.memory_space<vmem>>, vector<1x32x64xbf16>
      %52 = vector.shape_cast %51 : vector<1x32x64xbf16> to vector<32x64xbf16>
      %cst_34 = arith.constant dense<0.000000e+00> : vector<16x64xf32>
      %53 = tpu.matmul %50, %52, %cst_34 {dimension_numbers = #tpu.dot_dimension_numbers<[1], [0], [0], [1], [0, 0, 1, 1], [], []>} : vector<16x32xbf16>, vector<32x64xbf16>, vector<16x64xf32> -> vector<16x64xf32>
      %c0_35 = arith.constant 0 : index
      %c0_36 = arith.constant 0 : index
      %c0_37 = arith.constant 0 : index
      %54 = vector.load %arg8[%c0_35, %c0_36, %c0_37] : memref<1x1x64xf32, #tpu.memory_space<vmem>>, vector<1x1x64xf32>
      %55 = vector.shape_cast %54 : vector<1x1x64xf32> to vector<1x64xf32>
      %56 = vector.broadcast %55 : vector<1x64xf32> to vector<16x64xf32>
      %57 = arith.addf %53, %56 : vector<16x64xf32>
      %58 = math.tanh %57 : vector<16x64xf32>
      %59 = vector.shape_cast %58 : vector<16x64xf32> to vector<2x8x64xf32>
      %c0_38 = arith.constant 0 : index
      %c0_39 = arith.constant 0 : index
      %c0_40 = arith.constant 0 : index
      %60 = vector.load %arg12[%c0_38, %c0_39, %c0_40] : memref<2x8x64xf32, #tpu.memory_space<vmem>>, vector<2x8x64xf32>
      tpu.vector_store %arg12[%c0_38, %c0_39, %c0_40], %59 {strides = array<i32>} : memref<2x8x64xf32, #tpu.memory_space<vmem>>, vector<2x8x64xf32>,
    } else {
    }
    %c0 = arith.constant 0 : index
    %c0_1 = arith.constant 0 : index
    %c0_2 = arith.constant 0 : index
    %3 = vector.load %arg12[%c0, %c0_1, %c0_2] : memref<2x8x64xf32, #tpu.memory_space<vmem>>, vector<2x8x64xf32>
    %4 = vector.shape_cast %3 : vector<2x8x64xf32> to vector<16x64xf32>
    %5 = arith.truncf %4 : vector<16x64xf32> to vector<16x64xbf16>
    %c0_3 = arith.constant 0 : index
    %c0_4 = arith.constant 0 : index
    %c0_5 = arith.constant 0 : index
    %6 = vector.load %arg9[%c0_3, %c0_4, %c0_5] : memref<1x64x128xbf16, #tpu.memory_space<vmem>>, vector<1x64x128xbf16>
    %7 = vector.shape_cast %6 : vector<1x64x128xbf16> to vector<64x128xbf16>
    %cst = arith.constant dense<0.000000e+00> : vector<16x128xf32>
    %8 = tpu.matmul %5, %7, %cst {dimension_numbers = #tpu.dot_dimension_numbers<[1], [0], [0], [1], [0, 0, 1, 1], [], []>} : vector<16x64xbf16>, vector<64x128xbf16>, vector<16x128xf32> -> vector<16x128xf32>
    %c0_6 = arith.constant 0 : index
    %c0_7 = arith.constant 0 : index
    %c0_8 = arith.constant 0 : index
    %9 = vector.load %arg10[%c0_6, %c0_7, %c0_8] : memref<1x1x128xf32, #tpu.memory_space<vmem>>, vector<1x1x128xf32>
    %10 = vector.shape_cast %9 : vector<1x1x128xf32> to vector<1x128xf32>
    %11 = vector.broadcast %10 : vector<1x128xf32> to vector<16x128xf32>
    %12 = arith.addf %8, %11 : vector<16x128xf32>
    %13 = vector.shape_cast %12 : vector<16x128xf32> to vector<2x8x128xf32>
    %c0_9 = arith.constant 0 : index
    %c0_10 = arith.constant 0 : index
    %c0_11 = arith.constant 0 : index
    %c0_12 = arith.constant 0 : index
    %14 = vector.load %arg11[%c0_9, %c0_10, %c0_11, %c0_12] : memref<1x2x8x128xf32, #tpu.memory_space<vmem>>, vector<1x2x8x128xf32>
    %15 = vector.shape_cast %14 : vector<1x2x8x128xf32> to vector<2x8x128xf32>
    %16 = vector.shape_cast %13 : vector<2x8x128xf32> to vector<1x2x8x128xf32>
    tpu.vector_store %arg11[%c0_9, %c0_10, %c0_11, %c0_12], %16 {strides = array<i32>} : memref<1x2x8x128xf32, #tpu.memory_space<vmem>>, vector<1x2x8x128xf32>,
    return
  }
  func.func @transform_0(%arg0: i32, %arg1: i32, %arg2: i32) -> (i32, i32, i32) {
    %c0_i32 = arith.constant 0 : i32
    %c0_i32_0 = arith.constant 0 : i32
    %c0_i32_1 = arith.constant 0 : i32
    return %arg1, %c0_i32, %c0_i32_0 : i32, i32, i32
  }
  func.func @transform_1(%arg0: i32, %arg1: i32, %arg2: i32) -> (i32, i32, i32) {
    %c0_i32 = arith.constant 0 : i32
    %c0_i32_0 = arith.constant 0 : i32
    %c0_i32_1 = arith.constant 0 : i32
    return %arg1, %c0_i32, %c0_i32_0 : i32, i32, i32
  }
  func.func @transform_2(%arg0: i32, %arg1: i32, %arg2: i32) -> (i32, i32, i32) {
    %c0_i32 = arith.constant 0 : i32
    %c0_i32_0 = arith.constant 0 : i32
    %c0_i32_1 = arith.constant 0 : i32
    return %arg0, %c0_i32, %c0_i32_0 : i32, i32, i32
  }
  func.func @transform_3(%arg0: i32, %arg1: i32, %arg2: i32) -> (i32, i32, i32) {
    %c0_i32 = arith.constant 0 : i32
    %c0_i32_0 = arith.constant 0 : i32
    %c0_i32_1 = arith.constant 0 : i32
    return %arg0, %c0_i32, %c0_i32_0 : i32, i32, i32
  }
  func.func @transform_4(%arg0: i32, %arg1: i32, %arg2: i32) -> (i32, i32, i32) {
    %c0_i32 = arith.constant 0 : i32
    %c0_i32_0 = arith.constant 0 : i32
    %c0_i32_1 = arith.constant 0 : i32
    return %arg0, %c0_i32, %c0_i32_0 : i32, i32, i32
  }
  func.func @transform_5(%arg0: i32, %arg1: i32, %arg2: i32) -> (i32, i32, i32) {
    %c0_i32 = arith.constant 0 : i32
    %c0_i32_0 = arith.constant 0 : i32
    %c0_i32_1 = arith.constant 0 : i32
    return %arg0, %c0_i32, %c0_i32_0 : i32, i32, i32
  }
  func.func @transform_6(%arg0: i32, %arg1: i32, %arg2: i32) -> (i32, i32, i32) {
    %c0_i32 = arith.constant 0 : i32
    %c0_i32_0 = arith.constant 0 : i32
    return %arg0, %c0_i32, %arg2 : i32, i32, i32
  }
  func.func @transform_7(%arg0: i32, %arg1: i32, %arg2: i32) -> (i32, i32, i32) {
    %c0_i32 = arith.constant 0 : i32
    %c0_i32_0 = arith.constant 0 : i32
    return %arg0, %c0_i32, %arg2 : i32, i32, i32
  }
  func.func @transform_8(%arg0: i32, %arg1: i32, %arg2: i32) -> (i32, i32, i32, i32) {
    %c0_i32 = arith.constant 0 : i32
    %c0_i32_0 = arith.constant 0 : i32
    return %arg0, %arg1, %c0_i32, %arg2 : i32, i32, i32, i32
  }
}

</mosaic_0001>

<bundles_post_ra>
// kernel: tpu_custom_call.1
= control target key start
LH: loop header
LB: loop body
LE: loop exit
PB: predicated region body
PF: predicated region fallthrough
CT: control target
= control target key end

     0   :  { %s1809_s0 = inlined_call_operand.hbm [shape: bf16[2,16,32], index: 0, kind: input, shape index: {}]   ;;  %s1810_s1 = inlined_call_operand.hbm [shape: f32[2,1,16], index: 1, kind: input, shape index: {}]   ;;  %s1811_s2 = inlined_call_operand.hbm [shape: bf16[3,8,32], index: 2, kind: input, shape index: {}]   ;;  %s1812_s3 = inlined_call_operand.hbm [shape: bf16[3,32,64], index: 3, kind: input, shape index: {}]   ;;  %s1813_s4 = inlined_call_operand.hbm [shape: bf16[3,32,64], index: 4, kind: input, shape index: {}]   ;;  %s1814_s5 = inlined_call_operand.vmem [shape: f32[3,1,64], index: 5, kind: input, shape index: {}]   ;;  %s1815_s6 = inlined_call_operand.hbm [shape: bf16[3,64,128], index: 6, kind: input, shape index: {}]   ;;  %s1816_s7 = inlined_call_operand.vmem [shape: f32[3,1,128], index: 7, kind: input, shape index: {}]   ;;  %s1817_s8 = inlined_call_operand.hbm [shape: f32[3,2,8,128], index: 8, kind: output, shape index: {}]  }
   0x1   :  { %1823 = sst [smem:[#allocation24_spill]] %s1810_s1 }
   0x2   :  { %1824 = sst [smem:[#allocation25_spill]] %s1812_s3 }
   0x3   :  { %1825 = sst [smem:[#allocation26_spill]] %s1817_s8 }
   0x4   :  { %13 = vsyncpa [#allocation4], 0 }
   0x5   :  { %14 = vsyncpa [#allocation7], 0 }
   0x6   :  { %15 = vsyncpa [#allocation10], 0 }
   0x7   :  { %16 = vsyncpa [#allocation13], 0 }
   0x8   :  { %18 = vsyncpa [#allocation13 + $0x1], 0 }
   0x9   :  { %19 = vsyncpa [#allocation5], 0 }
   0xa   :  { %21 = vsyncpa [#allocation5 + $0x1], 0  ;;  %s1542_s27 = smov 0   ;;  %s1544_s28 = smov 0  }
   0xb   :  { %s1546_s29 = smov 0   ;;  %s1548_s30 = smov 0  }
   0xc   :  { %s1550_s9 = smov 0   ;;  %s1552_s10 = smov 0  }
   0xd LB: > { %1826 = sst [smem:[#allocation21_spill]] %s1463_s27  ;;  %s1818_s14 = sadd.s32 4294967295, %s1483_s10   ;;  %s1483_s10 = sphi %s1552_s10, %s27_s10   ;;  %s1479_s9 = sphi %s1550_s9, %s1848_s9   ;;  %s1475_s30 = sphi %s1548_s30, %s1847_s30   ;;  %s1471_s29 = sphi %s1546_s29, %s1846_s29   ;;  %s1467_s28 = sphi %s1544_s28, %s1845_s28   ;;  %s1463_s27 = sphi %s1542_s27, %s1844_s27  }
   0xe   : > { %s1827_s1 = sld [smem:[#allocation24_spill]]  ;;  %p997_p0 = scmp.ge.s32.totalorder %s1483_s10, 1 }
   0xf   : > { %p1579_p1 = scmp.eq.s32.totalorder %s1818_s14, 0  ;;  %p293_p2 = scmp.lt.s32.totalorder %s1483_s10, 4 }
  0x10   : > { %s1485_s17 = smov [#allocation6]   ;;  %s1486_s20 = smov 16  }
  0x11   : > { %p1584_p3 = pnand %p997_p0, %p293_p2  ;;  %s326_s18 = sshll.u32 %s1485_s17, 4  ;;  %s327_s18 = int_to_ptr.vmem [resolvable:$true] %s326_s18 }
  0x12   : > { %s1487_s21 = smov 1   ;;  %s996_s22 = sadd.s32 4294967294, %s1483_s10  }
  0x13   : > { %p1099_p4 = pneg %p1584_p3  ;;  %p118_p6 = scmp.ne.s32.totalorder %s1467_s28, %s1463_s27 }
  0x14   : > { %s324_s13 = sshll.u32 %s1827_s1, 4  ;;  %p286_p7 = scmp.eq.s32.totalorder %s996_s22, 2  ;;  %s325_s13 = int_to_ptr.hbm [resolvable:$true] %s324_s13 }
  0x15   : > { %p1592_p5 = pnand %p1099_p4, %p1579_p1  ;;  %p1603_p8 = por %p1579_p1, %p118_p6 }
  0x16   : > { %p1607_p9 = por %p286_p7, %p118_p6  ;;  %s1612_s25 = sshll.u32 %s1475_s30, 4 }
  0x17   : > { %1105 = dma.hbm_to_vmem [thread:$0]  (!%p1592_p5), %s325_s13, 32, %s327_s18, [#allocation7], %s1486_s20, %s1486_s20, %s1487_s21  }
  0x18   : > { %s1832_s24 = scalar_select %p1607_p9, 1, 0 }
  0x19   : > { %1834 = sst [smem:[#allocation23_spill]] %s1612_s25  ;;  %p1616_p10 = pnand %p1099_p4, %p1603_p8 }
  0x1a   : > { %1833 = sst [smem:[#allocation22_spill]] %s1832_s24  ;;  %s1488_s18 = smov [#allocation9]  }
  0x1b   : > { %s1836_s3 = sld [smem:[#allocation25_spill]]  ;;  %s357_s20 = sshll.u32 %s1488_s18, 4  ;;  %s358_s20 = int_to_ptr.vmem [resolvable:$true] %s357_s20 }
  0x1c   : > { %s371_s14 = scalar_lea.hbm %s1813_s4, %s1612_s25  ;;  %p1239_p12 = pneg %p1616_p10 }
  0x1d   : > { %s1628_s1 = sshll.u32 %s371_s14, 4  ;;  %s373_s1 = int_to_ptr.hbm [resolvable:$true] %s1628_s1 }
  0x21   : > { %s354_s13 = scalar_lea.hbm %s1836_s3, %s1612_s25 }
  0x22   : > { %s355_s17 = sshll.u32 %s354_s13, 4  ;;  %s1242_s13 = scalar_lea.hbm %s1836_s3, 48  ;;  %s356_s17 = int_to_ptr.hbm [resolvable:$true] %s355_s17 }
  0x23   : > { %s1235_s24 = sshra.s32 %s356_s17, 4  ;;  %s1236_s24 = int_to_ptr.hbm [resolvable:$true] %s1235_s24 }
  0x24   : > { %s1237_s27 = scalar_lea.hbm %s1236_s24, 16  ;;  %p1243_p2 = scmp.lt.s32.totalorder %s1236_s24, %s1836_s3 }
  0x25   : > { %p1238_p11 = scmp.ne.s32.totalorder %s1236_s24, %s1237_s27  ;;  %p1244_p4 = scmp.lt.s32.totalorder %s1242_s13, %s1237_s27 }
  0x27   : > { %p1240_p13 = pnand %p1239_p12, %p1238_p11  ;;  %p1245_p6 = por %p1244_p4, %p1243_p2 }
  0x29   : > { %p1241_p0 = pneg %p1240_p13 }
  0x2b   : > { %p1246_p7 = pnand %p1245_p6, %p1241_p0 }
  0x2d   : > { %1249 = shalt.err (!%p1246_p7)
}
  0x2e   : > { %s1489_s14 = smov 64   ;;  %s1490_s22 = smov 4  }
  0x2f   : > { %1111 = dma.hbm_to_vmem [thread:$0]  (!%p1616_p10), %s356_s17, 256, %s358_s20, [#allocation10], %s1489_s14, %s1489_s14, %s1490_s22  }
  0x30   : > { %s308_s8 = sshll.u32 %s1809_s0, 4  ;;  %s1491_s27 = smov [#allocation3]   ;;  %s309_s8 = int_to_ptr.hbm [resolvable:$true] %s308_s8 }
  0x31   : > { %s310_s24 = sshll.u32 %s1491_s27, 4  ;;  %s1000_s13 = sshll.u32 %s1475_s30, 2  ;;  %s311_s24 = int_to_ptr.vmem [resolvable:$true] %s310_s24 }
  0x32   : > { %1102 = dma.hbm_to_vmem [thread:$0]  (!%p1592_p5), %s309_s8, 256, %s311_s24, [#allocation4], %s1489_s14, %s1489_s14, %s1490_s22  }
  0x33   : > { %s339_s3 = scalar_lea.hbm %s1811_s2, %s1000_s13  ;;  %s1492_s20 = smov [#allocation8]  }
  0x34   : > { %s341_s17 = sshll.u32 %s339_s3, 4  ;;  %s343_s25 = sshll.u32 %s1492_s20, 4  ;;  %s342_s17 = int_to_ptr.hbm [resolvable:$true] %s341_s17  ;;  %s344_s25 = int_to_ptr.vmem [resolvable:$true] %s343_s25 }
  0x35   : > { %s1295_s11 = sshra.s32 %s342_s17, 4  ;;  %s1302_s8 = scalar_lea.hbm %s1811_s2, 12  ;;  %s1296_s11 = int_to_ptr.hbm [resolvable:$true] %s1295_s11 }
  0x36   : > { %s1297_s12 = scalar_lea.hbm %s1296_s11, 4  ;;  %p1303_p5 = scmp.lt.s32.totalorder %s1296_s11, %s1811_s2 }
  0x37   : > { %p1298_p11 = scmp.ne.s32.totalorder %s1296_s11, %s1297_s12  ;;  %p1304_p2 = scmp.lt.s32.totalorder %s1302_s8, %s1297_s12 }
  0x39   : > { %p1300_p13 = pnand %p1298_p11, %p1239_p12  ;;  %p1305_p4 = por %p1304_p2, %p1303_p5 }
  0x3b   : > { %p1301_p0 = pneg %p1300_p13 }
  0x3d   : > { %p1306_p6 = pnand %p1305_p4, %p1301_p0 }
  0x3f   : > { %1309 = shalt.err (!%p1306_p6)
}
  0x40   : > { %1108 = dma.hbm_to_vmem [thread:$0]  (!%p1616_p10), %s342_s17, 64, %s344_s25, [#allocation7]  }
  0x41   : > { %s1493_s3 = smov [#allocation11]   ;;  %s1325_s21 = sshra.s32 %s373_s1, 4  ;;  %s1326_s21 = int_to_ptr.hbm [resolvable:$true] %s1325_s21 }
  0x42   : > { %s374_s13 = sshll.u32 %s1493_s3, 4  ;;  %s1327_s20 = scalar_lea.hbm %s1326_s21, 16  ;;  %s375_s13 = int_to_ptr.vmem [resolvable:$true] %s374_s13 }
  0x43   : > { %p1328_p7 = scmp.ne.s32.totalorder %s1326_s21, %s1327_s20  ;;  %s1332_s19 = scalar_lea.hbm %s1813_s4, 48 }
  0x44   : > { %p1333_p0 = scmp.lt.s32.totalorder %s1326_s21, %s1813_s4  ;;  %p1334_p5 = scmp.lt.s32.totalorder %s1332_s19, %s1327_s20 }
  0x45   : > { %p1330_p11 = pnand %p1328_p7, %p1239_p12 }
  0x46   : > { %p1335_p2 = por %p1334_p5, %p1333_p0 }
  0x47   : > { %p1331_p13 = pneg %p1330_p11 }
  0x49   : > { %p1336_p4 = pnand %p1335_p2, %p1331_p13 }
  0x4b   : > { %1339 = shalt.err (!%p1336_p4)
}
  0x4c   : > { %1114 = dma.hbm_to_vmem [thread:$0]  (!%p1616_p10), %s373_s1, 256, %s375_s13, [#allocation10], %s1489_s14, %s1489_s14, %s1490_s22  }
  0x4d   : > { %s1837_s25 = sadd.s32 4294967295, %s1483_s10   ;;  %s46_s17 = sadd.s32 1, %s1479_s9 }
  0x4e   : > { %p280_p12 = scmp.eq.s32.totalorder %s1837_s25, 2  ;;  %p48_p6 = scmp.ge.s32.totalorder %s46_s17, 3 }
  0x4f   : > { %s105_s26 = sadd.s32 1, %s1471_s29  ;;  %p218_p7 = scmp.ne.s32.totalorder %s1471_s29, %s1467_s28 }
  0x50   : > { %p219_p11 = scmp.eq.s32.totalorder %s1483_s10, 0  ;;  %s1850_s17 = smov (%p48_p6, %s46_s17), 0 }
  0x51   : > { %p1693_p13 = por %p280_p12, %p218_p7  ;;  %p1125_p0 = scmp.lt.s32.totalorder %s1483_s10, 3 }
  0x52   : > { %s102_s18 = ssub.s32 %s1479_s9, %s1850_s17  ;;  %s394_s3 = sand.u32 1, %s1471_s29  }
  0x53   : > { %p103_p10 = scmp.eq.s32.totalorder %s102_s18, 0  ;;  %p220_p5 = por %p219_p11, %p218_p7 }
  0x54   : > { %s1006_s1 = sshll.u32 %s394_s3, 5  ;;  %s1069_s13 = sshll.u32 %s1479_s9, 5 }
  0x55   : > { %s1703_s21 = scalar_select %p103_p10, %s1471_s29, %s105_s26  }
  0x56   : > { %s404_s12 = scalar_lea.hbm %s1815_s6, %s1069_s13  ;;  %s398_s27 = scalar_lea.vmem [#allocation12], %s1006_s1 }
  0x57   : > { %s405_s19 = sshll.u32 %s404_s12, 4  ;;  %s407_s8 = sshll.u32 %s398_s27, 4  ;;  %s406_s19 = int_to_ptr.hbm [resolvable:$true] %s405_s19  ;;  %s408_s8 = int_to_ptr.vmem [resolvable:$true] %s407_s8 }
  0x58   : > { %p1116_p2 = pnand %p1125_p0, %p220_p5  ;;  %s395_s25 = scalar_lea.sflag [#allocation13], %s394_s3 }
  0x59   : > { %428 = sbr.rel (%p1584_p3) target bundleno = 1112 (0x458), region = 52 }
  0x5a   : > { %1118 = dma.hbm_to_vmem [thread:$0]  (!%p1116_p2), %s406_s19, 512, %s408_s8, %s395_s25, %s1489_s14, %s1489_s14, %s1490_s22  }
  0x5e   : > { %1438 = dma.done.wait (%p1579_p1), [#allocation4], 256  }
  0x5f   : > { %1440 = vsyncadd (%p1579_p1), [#allocation4], 4294967040 }
  0x60   : > { %1442 = dma.done.wait (%p1579_p1), [#allocation7], 32  }
  0x61   : > { %1444 = vsyncadd (%p1579_p1), [#allocation7], 4294967264 }
  0x62   : > { %1446 = dma.done.wait (%p1603_p8), [#allocation7], 64  }
  0x63   : > { %1448 = vsyncadd (%p1603_p8), [#allocation7], 4294967232 }
  0x64   : > { %1450 = dma.done.wait (%p1603_p8), [#allocation10], 512  }
  0x65   : > { %1452 = vsyncadd (%p1603_p8), [#allocation10], 4294966784  ;;  %s1732_s16 = sand.u32 1, %s1467_s28  }
  0x66   : > { %s1012_s15 = sshll.u32 %s1732_s16, 5  ;;  %s456_s14 = scalar_lea.sflag [#allocation13], %s1732_s16 }
  0x67   : > { %s1736_s22 = scalar_lea.vmem [#allocation12], %s1012_s15 }
  0x68   : > { %1454 = dma.done.wait (%p1603_p8), %s456_s14, 512  }
  0x69   : > { %1456 = vsyncadd (%p1603_p8), %s456_s14, 4294966784  ;;  %v1073_v0 = vld [vmem:[#allocation9 + $0x8] sm:$0xff]  ;;  %v1072_v1 = vld [vmem:[#allocation9] sm:$0xff]  ;;  %vm549_vm0 = vcmask 261120   ;;  %vm637_vm1 = vcmask 130048   ;;  %s1494_s23 = smov 96  }
  0x6a   : > { %562 = vmatpush.bf16.msra.mxu0 %v1073_v0  ;;  %v1070_v2 = vld [vmem:[#allocation3] sm:$0xff]  ;;  %v1071_v3 = vld [vmem:[#allocation3 + $0x8] sm:$0xff]  ;;  %v579_v13 = vld [vmem:[#allocation8] sm:$0xf]  ;;  %p504_p1 = scmp.lt.s32.totalorder %s1475_s30, 2  ;;  %vm740_vm2 = vcmask 523264  }
  0x6b   : > { %v1189_v21 = vld [vmem:[#allocation6] ss:$0 sm:$0xff]  ;;  %v1190_v27 = vld [vmem:[#allocation6 + $0x1] ss:$0 sm:$0xff]  ;;  %v1074_v54 = vld [vmem:[#allocation11] sm:$0xff]  ;;  %s1839_s11 = sld [smem:[#allocation23_spill]] }
  0x6c   : > { %s1852_s30 = smov (!%p504_p1, %s1475_s30), 2  ;;  %v1075_v53 = vld [vmem:[#allocation11 + $0x8] sm:$0xff]  ;;  %v1078_v61 = vld [vmem:[%s1736_s22 + $0x10] sm:$0xff]  ;;  %v1077_v62 = vld [vmem:[%s1736_s22 + $0x8] sm:$0xff]  ;;  %s1840_s27 = sld [smem:[#allocation26_spill]] }
  0x6d   : > { %s506_s3 = scalar_lea.vmem %s1814_s5, %s1852_s30  ;;  %s512_s20 = scalar_lea.vmem %s1816_s7, %s1852_s30  ;;  %v1079_v60 = vld [vmem:[%s1736_s22 + $0x18] sm:$0xff]  ;;  %v1076_v63 = vld [vmem:[%s1736_s22] sm:$0xff] }
  0x6e   : > { %563 = vmatpush.bf16.msra.mxu0 %v1072_v1  ;;  %v1191_v0 = vld [vmem:[%s506_s3] ss:$0 sm:$0xff]  ;;  %s1013_s30 = sshll.u32 %s1732_s16, 4 }
  0x6f   : > { %s501_s15 = scalar_lea.vmem [#allocation14], %s1013_s30 }
  0x70   : > { %s818_s14 = sshll.u32 %s501_s15, 4  ;;  %s819_s14 = int_to_ptr.vmem [resolvable:$true] %s818_s14 }
  0x71   : > { %1030 = vmatmul.msk.bf16.vlgmr.msra.gmra.mxu0 %vm549_vm0, %v1070_v2 }
  0x72   : > { %s1841_s8 = smov %s1840_s27  ;;  %s817_s25 = scalar_lea.hbm %s1840_s27, %s1839_s11 }
  0x73   : > { %s820_s22 = sshll.u32 %s817_s25, 4  ;;  %s1405_s13 = scalar_lea.hbm %s1841_s8, 48  ;;  %s821_s22 = int_to_ptr.hbm [resolvable:$true] %s820_s22 }
  0x74   : > { %s1399_s26 = sshra.s32 %s821_s22, 4  ;;  %s1400_s26 = int_to_ptr.hbm [resolvable:$true] %s1399_s26 }
  0x75   : > { %s1401_s18 = scalar_lea.hbm %s1400_s26, 16  ;;  %p1406_p12 = scmp.lt.s32.totalorder %s1400_s26, %s1841_s8 }
  0x76   : > { %p1402_p3 = scmp.ne.s32.totalorder %s1400_s26, %s1401_s18  ;;  %p1407_p6 = scmp.lt.s32.totalorder %s1405_s13, %s1401_s18 }
  0x78   : > { %p1403_p8 = pnand %p1402_p3, %p1693_p13  ;;  %p1408_p7 = por %p1407_p6, %p1406_p12 }
  0x7a   : > { %p1404_p4 = pneg %p1403_p8 }
  0x7c   : > { %p1409_p11 = pnand %p1408_p7, %p1404_p4 }
  0x81   : > { %1031 = vmatmul.msk.bf16.gmra.mxu0 %vm549_vm0, %v1071_v3 }
  0xee   : > { %v565_v4 = vpop.f32.mrf.mxu0 }
  0xef   : > { %v575_v5 = vpack.c.bf16 %v565_v4, %v565_v4 }
  0xf1   : > { %v582_v8 = vunpack.c.l.b16 %v575_v5 }
  0xf6   : > { %v567_v6 = vpop.f32.mrf.mxu0 }
  0xf7   : > { %v576_v7 = vpack.c.bf16 %v567_v6, %v567_v6 }
  0xf9   : > { %v583_v9 = vunpack.c.l.b16 %v576_v7 }
  0xfb   : > { %v584_v10 = vpack.c.b16 %v583_v9, %v582_v8 }
  0xfd   : > { %v589_v11 = vsel %vm549_vm0, %v584_v10, 0 }
  0xfe   : > { %v570_v12 = vpop.f32.mrf.mxu0  ;;  %598 = vmatpush.bf16.xpose.msra.mxu1 %v589_v11 }
  0xff   : > { %v577_v14 = vpack.c.bf16 %v570_v12, %v570_v12 }
 0x101   : > { %v606_v16 = vunpack.c.l.b16 %v577_v14 }
 0x105   : > { %1032 = vmatmul.msk.bf16.vlgmr.msra.gmra.mxu1 %vm549_vm0, %v579_v13 }
 0x106   : > { %v572_v15 = vpop.f32.mrf.mxu0  ;;  %730 = vmatpush.bf16.msrb.mxu1 %v1075_v53 }
 0x107   : > { %v578_v17 = vpack.c.bf16 %v572_v15, %v572_v15 }
 0x109   : > { %v607_v18 = vunpack.c.l.b16 %v578_v17 }
 0x10a   : > { %731 = vmatpush.bf16.msrb.mxu1 %v1074_v54 }
 0x10b   : > { %v608_v19 = vpack.c.b16 %v607_v18, %v606_v16 }
 0x10d   : > { %v610_v20 = vsel %vm549_vm0, %v608_v19, 0 }
 0x10e   : > { %619 = vmatpush.bf16.xpose.msra.mxu2 %v610_v20 }
 0x115   : > { %1033 = vmatmul.msk.bf16.vlgmr.msra.gmra.mxu2 %vm549_vm0, %v579_v13 }
 0x116   : > { %790 = vmatpush.bf16.msrb.mxu2 %v1079_v60 }
 0x11a   : > { %791 = vmatpush.bf16.msrb.mxu2 %v1078_v61 }
 0x11e   : > { %792 = vmatpush.bf16.msrb.mxu2 %v1077_v62 }
 0x122   : > { %793 = vmatpush.bf16.msrb.mxu2 %v1076_v63 }
 0x182   : > { %v600_v22 = vpop.f32.mrf.mxu1 }
 0x183   : > { %v625_v23 = vmul.f32 0.17677669, %v600_v22 }
 0x185   : > { %v635_v24 = vadd.f32 %v1189_v21, %v625_v23 }
 0x187   : > { %v638_v25 = vsel %vm637_vm1, %v635_v24, -inf }
 0x188   : > { %639 = vmax.xlane.f32.xlu0 %v638_v25 }
 0x18a   : > { %v602_v26 = vpop.f32.mrf.mxu1 }
 0x198   : > { %v621_v28 = vpop.f32.mrf.mxu2 }
 0x199   : > { %v626_v29 = vmul.f32 0.17677669, %v621_v28 }
 0x19b   : > { %v636_v30 = vadd.f32 %v1190_v27, %v626_v29 }
 0x19d   : > { %v641_v31 = vsel %vm637_vm1, %v636_v30, -inf }
 0x19e   : > { %642 = vmax.xlane.f32.xlu0 %v641_v31 }
 0x1a0   : > { %v623_v32 = vpop.f32.mrf.mxu2 }
 0x1fb   : > { %v640_v33 = vpop.xlane.xlu0 %639 }
 0x1fc   : > { %v644_v34 = vsub.f32 %v635_v24, %v640_v33 }
 0x1fe   : > { %v646_v35 = vmul.f32 1.442695, %v644_v34 }
 0x200   : > { %1193 = vpow2.f32 %v646_v35 }
 0x206   : > { %v1194_v36 = vpop.eup %1193 }
 0x207   : > { %v650_v37 = vsel %vm637_vm1, %v1194_v36, 0.0 }
 0x208   : > { %651 = vadd.xlane.f32.xlu1 %v650_v37 }
 0x211   : > { %v643_v38 = vpop.xlane.xlu0 %642 }
 0x212   : > { %v645_v39 = vsub.f32 %v636_v30, %v643_v38 }
 0x214   : > { %v648_v40 = vmul.f32 1.442695, %v645_v39 }
 0x216   : > { %1195 = vpow2.f32 %v648_v40 }
 0x21c   : > { %v1196_v41 = vpop.eup %1195 }
 0x21d   : > { %v653_v42 = vsel %vm637_vm1, %v1196_v41, 0.0 }
 0x21e   : > { %654 = vadd.xlane.f32.xlu2 %v653_v42 }
 0x221   : > { %662 = vrot.lane.b32.xlu1 %v584_v10, %s1494_s23  ;;  %v1192_v10 = vld [vmem:[%s512_s20] ss:$0 sm:$0xff] }
 0x236   : > { %681 = vrot.lane.b32.xlu2 %v608_v19, %s1494_s23  ;;  %s803_s23 = scalar_lea.sflag [#allocation5], %s1732_s16 }
 0x27b   : > { %v652_v43 = vpop.xlane.xlu1 %651 }
 0x27c   : > { %1197 = vrcp.f32 %v652_v43 }
 0x282   : > { %v1198_v44 = vpop.eup %1197 }
 0x283   : > { %v658_v46 = vmul.f32 %v1198_v44, %v1194_v36 }
 0x285   : > { %v660_v48 = vpack.c.bf16 %v658_v46, %v658_v46 }
 0x291   : > { %v655_v45 = vpop.xlane.xlu2 %654 }
 0x292   : > { %1199 = vrcp.f32 %v655_v45 }
 0x293   : > { %v663_v47 = vpop.permute.xlu1 %662 }
 0x294   : > { %675 = vmatpush.bf16.msra.mxu3 %v663_v47 }
 0x297   : > { %1034 = vmatmul.msk.bf16.vlgmr.msra.gmra.mxu3 %vm637_vm1, %v660_v48 }
 0x298   : > { %v1200_v50 = vpop.eup %1199 }
 0x299   : > { %v682_v49 = vpop.permute.xlu2 %681  ;;  %v659_v51 = vmul.f32 %v1200_v50, %v1196_v41 }
 0x29a   : > { %694 = vmatpush.bf16.msrb.mxu3 %v682_v49 }
 0x29b   : > { %v661_v52 = vpack.c.bf16 %v659_v51, %v659_v51 }
 0x2a7   : > { %1035 = vmatmul.msk.bf16.vlgmr.msrb.gmra.mxu3 %vm637_vm1, %v661_v52 }
 0x31a   : > { %v677_v55 = vpop.f32.mrf.mxu3 }
 0x322   : > { %v679_v56 = vpop.f32.mrf.mxu3 }
 0x32a   : > { %v696_v57 = vpop.f32.mrf.mxu3 }
 0x32b   : > { %v700_v58 = vpack.c.bf16 %v696_v57, %v677_v55 }
 0x32d   : > { %1044 = vmatmul.msk.bf16.vlgmr.msrb.gmra.mxu1 %vm549_vm0, %v700_v58 }
 0x332   : > { %v698_v59 = vpop.f32.mrf.mxu3 }
 0x3aa   : > { %v733_v1 = vpop.f32.mrf.mxu1 }
 0x3ab   : > { %v734_v2 = vadd.f32 %v1191_v0, %v733_v1 }
 0x3ad   : > { %1201 = vtanh.f32 %v734_v2 }
 0x3b2   : > { %v735_v3 = vpop.f32.mrf.mxu1 }
 0x3b3   : > { %v1202_v4 = vpop.eup %1201  ;;  %v736_v5 = vadd.f32 %v1191_v0, %v735_v3 }
 0x3b4   : > { %741 = vst.msk [vmem:[#allocation2] sm:$0xff] %vm740_vm2, %v1202_v4 }
 0x3b5   : > { %1203 = vtanh.f32 %v736_v5 }
 0x3bb   : > { %v1204_v6 = vpop.eup %1203  ;;  %v743_v7 = vld [vmem:[#allocation2] sm:$0xff] }
 0x3bc   : > { %742 = vst.msk [vmem:[#allocation2 + $0x8] sm:$0xff] %vm740_vm2, %v1204_v6 }
 0x3c3   : > { %v744_v8 = vld [vmem:[#allocation2 + $0x8] sm:$0xff] }
 0x3c4   : > { %v745_v9 = vpack.c.bf16 %v744_v8, %v743_v7 }
 0x3c6   : > { %1061 = vmatmul.msk.bf16.vlgmr.msrb.gmra.mxu2 %vm740_vm2, %v745_v9 }
 0x449   : > { %v795_v11 = vpop.f32.mrf.mxu2 }
 0x44a   : > { %v796_v12 = vadd.f32 %v1192_v10, %v795_v11 }
 0x44c   : > { %800 = vst [vmem:[%s501_s15] sm:$0xff] %v796_v12 }
 0x451   : > { %v797_v13 = vpop.f32.mrf.mxu2 }
 0x452   : > { %v798_v14 = vadd.f32 %v1192_v10, %v797_v13 }
 0x454   : > { %801 = vst [vmem:[%s501_s15 + $0x8] sm:$0xff] %v798_v14 }
 0x455   : > { %1412 = shalt.err (!%p1409_p11)
}
 0x456   : > { %s1495_s16 = smov 128   ;;  %s1496_s30 = smov 8  }
 0x457   : > { %1097 = dma.vmem_to_hbm [thread:$0]  (%p1693_p13), %s819_s14, 256, %s821_s22, %s803_s23, %s1495_s16, %s1495_s16, %s1496_s30  }
 0x458 PF: > { %s1842_s12 = sld [smem:[#allocation21_spill]]  ;;  %p1128_p0 = scmp.ge.s32.totalorder %s1483_s10, 2 }
 0x45a   : > { %p1120_p10 = pnand %p1128_p0, %p1607_p9 }
 0x45c   : > { %p1121_p5 = pneg %p1120_p10 }
 0x45e   : > { %s835_s27 = sand.u32 1, %s1842_s12  }
 0x45f   : > { %s836_s25 = scalar_lea.sflag [#allocation5], %s835_s27 }
 0x460   : > { %1458 = dma.done.wait (%p1121_p5), %s836_s25, 256  }
 0x461   : > { %1460 = vsyncadd (%p1121_p5), %s836_s25, 4294967040  ;;  %s27_s10 = sadd.s32 1, %s1483_s10   ;;  %s1844_s27 = smov %s1467_s28 }
 0x462   : > { %p24_p2 = scmp.ge.s32.totalorder %s27_s10, 5   ;;  %s1845_s28 = smov %s1471_s29 }
 0x463   : > { %s1846_s29 = smov %s1703_s21  ;;  %s1847_s30 = smov %s1479_s9 }
 0x464   : > { %s1848_s9 = smov %s1850_s17  ;;  %26 = sbr.rel (!%p24_p2) target bundleno = 13 (0xd), region = 133 }
 0x469   :  { %842 = vsyncpa [#allocation4], 1 }
 0x46a   :  { %844 = vsyncpa [#allocation4 + $0x1], 1 }
 0x46b   :  { %845 = vsyncpa [#allocation7], 1 }
 0x46c   :  { %846 = vsyncpa [#allocation10], 1 }
 0x46d   :  { %847 = vsyncpa [#allocation13], 1 }
 0x46e   :  { %849 = vsyncpa [#allocation13 + $0x1], 1 }
 0x46f   :  { %850 = vsyncpa [#allocation5], 1 }
 0x470   :  { %852 = vsyncpa [#allocation5 + $0x1], 1 }

// kernel: tpu_custom_call.1
= control target key start
LH: loop header
LB: loop body
LE: loop exit
PB: predicated region body
PF: predicated region fallthrough
CT: control target
= control target key end

     0   :  { %s1834_s0 = inlined_call_operand.hbm [shape: bf16[2,16,32], index: 0, kind: input, shape index: {}]   ;;  %s1835_s1 = inlined_call_operand.hbm [shape: f32[2,1,16], index: 1, kind: input, shape index: {}]   ;;  %s1836_s2 = inlined_call_operand.hbm [shape: bf16[3,8,32], index: 2, kind: input, shape index: {}]   ;;  %s1837_s3 = inlined_call_operand.hbm [shape: bf16[3,32,64], index: 3, kind: input, shape index: {}]   ;;  %s1838_s4 = inlined_call_operand.hbm [shape: bf16[3,32,64], index: 4, kind: input, shape index: {}]   ;;  %s1839_s5 = inlined_call_operand.vmem [shape: f32[3,1,64], index: 5, kind: input, shape index: {}]   ;;  %s1840_s6 = inlined_call_operand.hbm [shape: bf16[3,64,128], index: 6, kind: input, shape index: {}]   ;;  %s1841_s7 = inlined_call_operand.vmem [shape: f32[3,1,128], index: 7, kind: input, shape index: {}]   ;;  %s1842_s8 = inlined_call_operand.hbm [shape: f32[3,2,8,128], index: 8, kind: output, shape index: {}]  }
   0x1   :  { %1856 = sst [smem:[#allocation24_spill]] %s1834_s0 }
   0x2   :  { %1857 = sst [smem:[#allocation25_spill]] %s1836_s2 }
   0x3   :  { %1858 = sst [smem:[#allocation26_spill]] %s1842_s8 }
   0x4   :  { %13 = vsyncpa [#allocation4], 0 }
   0x5   :  { %14 = vsyncpa [#allocation7], 0 }
   0x6   :  { %15 = vsyncpa [#allocation5], 0 }
   0x7   :  { %17 = vsyncpa [#allocation5 + $0x1], 0  ;;  %s1595_s27 = smov 0   ;;  %s1597_s28 = smov 0  }
   0x8   :  { %s1599_s29 = smov 0   ;;  %s1601_s30 = smov 0  }
   0x9   :  { %s1603_s9 = smov 0   ;;  %s1605_s10 = smov 0  }
   0xa LB: > { %1859 = sst [smem:[#allocation17_spill]] %s1519_s27  ;;  %s1626_s11 = sadd.s32 4294967295, %s1539_s10   ;;  %s1539_s10 = sphi %s1605_s10, %s23_s10   ;;  %s1535_s9 = sphi %s1603_s9, %s1888_s9   ;;  %s1531_s30 = sphi %s1601_s30, %s1887_s30   ;;  %s1527_s29 = sphi %s1599_s29, %s1883_s29   ;;  %s1523_s28 = sphi %s1597_s28, %s1886_s28   ;;  %s1519_s27 = sphi %s1595_s27, %s1885_s27  }
   0xb   : > { %1860 = sst [smem:[#allocation18_spill]] %s1527_s29  ;;  %s1057_s12 = sadd.s32 4294967294, %s1539_s10  }
   0xc   : > { %1861 = sst [smem:[#allocation19_spill]] %s1539_s10  ;;  %p114_p0 = scmp.ne.s32.totalorder %s1523_s28, %s1519_s27 }
   0xd   : > { %p115_p1 = scmp.eq.s32.totalorder %s1626_s11, 0  ;;  %p276_p2 = scmp.eq.s32.totalorder %s1626_s11, 2 }
   0xe   : > { %p282_p3 = scmp.eq.s32.totalorder %s1057_s12, 2  ;;  %p1058_p5 = scmp.ge.s32.totalorder %s1539_s10, 1 }
   0xf   : > { %p1635_p4 = por %p115_p1, %p114_p0  ;;  %p289_p7 = scmp.lt.s32.totalorder %s1539_s10, 4 }
  0x10   : > { %p1640_p6 = por %p282_p3, %p114_p0  ;;  %s1865_s0 = sld [smem:[#allocation24_spill]] }
  0x11   : > { %p1648_p8 = pnand %p1058_p5, %p289_p7  ;;  %s1541_s19 = smov [#allocation3]  }
  0x12   : > { %s1863_s14 = scalar_select %p1640_p6, 1, 0 }
  0x13   : > { %p1166_p9 = pneg %p1648_p8  ;;  %s306_s20 = sshll.u32 %s1541_s19, 4  ;;  %s307_s20 = int_to_ptr.vmem [resolvable:$true] %s306_s20 }
  0x14   : > { %1864 = sst [smem:[#allocation20_spill]] %s1863_s14  ;;  %s1843_s22 = smov 64  }
  0x15   : > { %p1656_p10 = pnand %p1166_p9, %p115_p1  ;;  %s1845_s23 = smov 4  }
  0x16   : > { %s304_s17 = sshll.u32 %s1865_s0, 4  ;;  %s42_s24 = sadd.s32 1, %s1535_s9  ;;  %s305_s17 = int_to_ptr.hbm [resolvable:$true] %s304_s17 }
  0x17   : > { %1169 = dma.hbm_to_vmem [thread:$0]  (!%p1656_p10), %s305_s17, 256, %s307_s20, [#allocation4], %s1843_s22, %s1843_s22, %s1845_s23  }
  0x18   : > { %p44_p11 = scmp.ge.s32.totalorder %s42_s24, 3  ;;  %s101_s25 = sadd.s32 1, %s1527_s29 }
  0x19   : > { %p108_p12 = scmp.ne.s32.totalorder %s1527_s29, %s1523_s28  ;;  %p109_p13 = scmp.eq.s32.totalorder %s1539_s10, 0 }
  0x1a   : > { %s1890_s24 = smov (%p44_p11, %s42_s24), 0  ;;  %p1192_p5 = scmp.lt.s32.totalorder %s1539_s10, 3 }
  0x1b   : > { %1868 = sst [smem:[#allocation21_spill]] %s1890_s24  ;;  %p1672_p0 = por %p109_p13, %p108_p12 }
  0x1c   : > { %p1678_p3 = por %p276_p2, %p108_p12  ;;  %s98_s15 = ssub.s32 %s1535_s9, %s1890_s24 }
  0x1d   : > { %p99_p7 = scmp.eq.s32.totalorder %s98_s15, 0  ;;  %s336_s16 = sand.u32 1, %s1539_s10  }
  0x1e   : > { %s1870_s12 = scalar_select %p1678_p3, 1, 0 }
  0x1f   : > { %s1687_s17 = sand.u32 1, %s1527_s29   ;;  %s1063_s22 = sshll.u32 %s1535_s9, 2 }
  0x20   : > { %1871 = sst [smem:[#allocation22_spill]] %s1870_s12  ;;  %s1062_s20 = sshll.u32 %s1687_s17, 2 }
  0x21   : > { %s1690_s19 = scalar_select %p99_p7, %s1527_s29, %s101_s25  }
  0x22   : > { %s1873_s2 = sld [smem:[#allocation25_spill]]  ;;  %s340_s12 = scalar_lea.vmem [#allocation8], %s1062_s20 }
  0x23   : > { %1872 = sst [smem:[#allocation23_spill]] %s1690_s19  ;;  %s348_s24 = sshll.u32 %s340_s12, 4  ;;  %s349_s24 = int_to_ptr.vmem [resolvable:$true] %s348_s24 }
  0x24   : > { %p1701_p2 = pnand %p1192_p5, %p1672_p0  ;;  %s1064_s25 = sshll.u32 %s1687_s17, 4 }
  0x25   : > { %s1070_s19 = sshll.u32 %s1687_s17, 5  ;;  %s1707_s29 = scalar_lea.sflag [#allocation4], %s336_s16 }
  0x26   : > { %s1134_s0 = sshll.u32 %s1535_s9, 4  ;;  %s1875_s16 = smov 4  }
  0x27   : > { %s364_s12 = scalar_lea.hbm %s1837_s3, %s1134_s0  ;;  %s1876_s17 = smov 64  }
  0x28   : > { %s344_s14 = scalar_lea.hbm %s1873_s2, %s1063_s22  ;;  %s365_s20 = sshll.u32 %s364_s12, 4  ;;  %s366_s20 = int_to_ptr.hbm [resolvable:$true] %s365_s20 }
  0x29   : > { %s346_s27 = sshll.u32 %s344_s14, 4  ;;  %s409_s14 = scalar_lea.vmem [#allocation11], %s1070_s19  ;;  %s347_s27 = int_to_ptr.hbm [resolvable:$true] %s346_s27 }
  0x2a   : > { %1176 = dma.hbm_to_vmem [thread:$0]  (!%p1701_p2), %s347_s27, 64, %s349_s24, %s1707_s29  }
  0x2b   : > { %s418_s22 = sshll.u32 %s409_s14, 4  ;;  %s359_s2 = scalar_lea.vmem [#allocation9], %s1064_s25  ;;  %s419_s22 = int_to_ptr.vmem [resolvable:$true] %s418_s22 }
  0x2c   : > { %s367_s10 = sshll.u32 %s359_s2, 4  ;;  %s386_s19 = scalar_lea.hbm %s1838_s4, %s1134_s0  ;;  %s368_s10 = int_to_ptr.vmem [resolvable:$true] %s367_s10 }
  0x2d   : > { %1179 = dma.hbm_to_vmem [thread:$0]  (!%p1701_p2), %s366_s20, 256, %s368_s10, %s1707_s29, %s1876_s17, %s1876_s17, %s1875_s16  }
  0x2e   : > { %s381_s14 = scalar_lea.vmem [#allocation10], %s1064_s25  ;;  %s387_s23 = sshll.u32 %s386_s19, 4  ;;  %s388_s23 = int_to_ptr.hbm [resolvable:$true] %s387_s23 }
  0x2f   : > { %s389_s8 = sshll.u32 %s381_s14, 4  ;;  %s320_s12 = sshll.u32 %s1835_s1, 4  ;;  %s390_s8 = int_to_ptr.vmem [resolvable:$true] %s389_s8  ;;  %s321_s12 = int_to_ptr.hbm [resolvable:$true] %s320_s12 }
  0x30   : > { %1182 = dma.hbm_to_vmem [thread:$0]  (!%p1701_p2), %s388_s23, 256, %s390_s8, %s1707_s29, %s1876_s17, %s1876_s17, %s1875_s16  }
  0x31   : > { %s1544_s10 = smov [#allocation6]   ;;  %s1545_s25 = smov 16  }
  0x32   : > { %s322_s20 = sshll.u32 %s1544_s10, 4  ;;  %s1546_s0 = smov 1   ;;  %s323_s20 = int_to_ptr.vmem [resolvable:$true] %s322_s20 }
  0x33   : > { %1172 = dma.hbm_to_vmem [thread:$0]  (!%p1656_p10), %s321_s12, 32, %s323_s20, [#allocation7], %s1545_s25, %s1545_s25, %s1546_s0  }
  0x34   : > { %s1136_s27 = sshll.u32 %s1535_s9, 5  ;;  %439 = sbr.rel (%p1648_p8) target bundleno = 1073 (0x431), region = 52 }
  0x35   : > { %s415_s14 = scalar_lea.hbm %s1840_s6, %s1136_s27 }
  0x36   : > { %s416_s2 = sshll.u32 %s415_s14, 4  ;;  %s417_s2 = int_to_ptr.hbm [resolvable:$true] %s416_s2 }
  0x37   : > { %1185 = dma.hbm_to_vmem [thread:$0]  (!%p1701_p2), %s417_s2, 512, %s419_s22, %s1707_s29, %s1876_s17, %s1876_s17, %s1875_s16  }
  0x39   : > { %1502 = dma.done.wait (%p115_p1), [#allocation4], 256  }
  0x3a   : > { %1504 = vsyncadd (%p115_p1), [#allocation4], 4294967040 }
  0x3b   : > { %1506 = dma.done.wait (%p115_p1), [#allocation7], 32  }
  0x3c   : > { %1508 = vsyncadd (%p115_p1), [#allocation7], 4294967264  ;;  %s451_s8 = sand.u32 1, %s1626_s11   ;;  %s1758_s29 = sand.u32 1, %s1523_s28  }
  0x3d   : > { %s1076_s18 = sshll.u32 %s1758_s29, 2  ;;  %s452_s21 = scalar_lea.sflag [#allocation4], %s451_s8 }
  0x3e   : > { %s455_s15 = scalar_lea.vmem [#allocation8], %s1076_s18 }
  0x3f   : > { %1510 = dma.done.wait (%p1635_p4), %s452_s21, 1088  }
  0x40   : > { %1512 = vsyncadd (%p1635_p4), %s452_s21, 4294966208  ;;  %s1766_s22 = sshll.u32 %s1758_s29, 4  ;;  %v1137_v2 = vld [vmem:[#allocation3] sm:$0xff]  ;;  %vm590_vm0 = vcmask 261120   ;;  %v1138_v3 = vld [vmem:[#allocation3 + $0x8] sm:$0xff]  ;;  %vm678_vm1 = vcmask 130048  }
  0x41   : > { %s465_s16 = scalar_lea.vmem [#allocation9], %s1766_s22  ;;  %v620_v13 = vld [vmem:[%s455_s15] sm:$0xf]  ;;  %v1253_v21 = vld [vmem:[#allocation6] ss:$0 sm:$0xff]  ;;  %s1547_s11 = smov 96  }
  0x42   : > { %v1140_v0 = vld [vmem:[%s465_s16 + $0x8] sm:$0xff]  ;;  %v1139_v1 = vld [vmem:[%s465_s16] sm:$0xff]  ;;  %p545_p1 = scmp.lt.s32.totalorder %s1531_s30, 2  ;;  %s475_s12 = scalar_lea.vmem [#allocation10], %s1766_s22  ;;  %vm781_vm2 = vcmask 523264  }
  0x43   : > { %603 = vmatpush.bf16.msra.mxu0 %v1140_v0  ;;  %v1254_v27 = vld [vmem:[#allocation6 + $0x1] ss:$0 sm:$0xff]  ;;  %v1142_v53 = vld [vmem:[%s475_s12 + $0x8] sm:$0xff]  ;;  %s1079_s0 = sshll.u32 %s1758_s29, 5  ;;  %s1147_s24 = sshll.u32 %s1531_s30, 4 }
  0x44   : > { %s1783_s13 = scalar_select %p545_p1, %s1531_s30, 2  ;;  %v1141_v54 = vld [vmem:[%s475_s12] sm:$0xff] }
  0x45   : > { %s485_s27 = scalar_lea.vmem [#allocation11], %s1079_s0  ;;  %s1877_s2 = sld [smem:[#allocation26_spill]] }
  0x46   : > { %s547_s26 = scalar_lea.vmem %s1839_s5, %s1783_s13  ;;  %s553_s25 = scalar_lea.vmem %s1841_s7, %s1783_s13  ;;  %v1146_v60 = vld [vmem:[%s485_s27 + $0x18] sm:$0xff]  ;;  %v1145_v61 = vld [vmem:[%s485_s27 + $0x10] sm:$0xff]  ;;  %v1144_v62 = vld [vmem:[%s485_s27 + $0x8] sm:$0xff] }
  0x47   : > { %604 = vmatpush.bf16.msra.mxu0 %v1139_v1  ;;  %v1143_v63 = vld [vmem:[%s485_s27] sm:$0xff]  ;;  %v1255_v0 = vld [vmem:[%s547_s26] ss:$0 sm:$0xff]  ;;  %s542_s21 = scalar_lea.vmem [#allocation12], %s1766_s22 }
  0x48   : > { %s859_s15 = sshll.u32 %s542_s21, 4  ;;  %s860_s15 = int_to_ptr.vmem [resolvable:$true] %s859_s15 }
  0x4a   : > { %1097 = vmatmul.msk.bf16.vlgmr.msra.gmra.mxu0 %vm590_vm0, %v1137_v2 }
  0x4b   : > { %s858_s18 = scalar_lea.hbm %s1877_s2, %s1147_s24  ;;  %s1469_s22 = scalar_lea.hbm %s1877_s2, 48 }
  0x4c   : > { %s861_s16 = sshll.u32 %s858_s18, 4  ;;  %s862_s16 = int_to_ptr.hbm [resolvable:$true] %s861_s16 }
  0x4d   : > { %s1463_s13 = sshra.s32 %s862_s16, 4  ;;  %s1464_s13 = int_to_ptr.hbm [resolvable:$true] %s1463_s13 }
  0x4e   : > { %s1465_s30 = scalar_lea.hbm %s1464_s13, 16  ;;  %p1470_p10 = scmp.lt.s32.totalorder %s1464_s13, %s1877_s2 }
  0x4f   : > { %p1466_p4 = scmp.ne.s32.totalorder %s1464_s13, %s1465_s30  ;;  %p1471_p11 = scmp.lt.s32.totalorder %s1469_s22, %s1465_s30 }
  0x51   : > { %p1467_p8 = pnand %p1466_p4, %p1678_p3  ;;  %p1472_p12 = por %p1471_p11, %p1470_p10 }
  0x53   : > { %p1468_p9 = pneg %p1467_p8 }
  0x55   : > { %p1473_p13 = pnand %p1472_p12, %p1468_p9 }
  0x5a   : > { %1098 = vmatmul.msk.bf16.gmra.mxu0 %vm590_vm0, %v1138_v3 }
  0xc7   : > { %v606_v4 = vpop.f32.mrf.mxu0 }
  0xc8   : > { %v616_v5 = vpack.c.bf16 %v606_v4, %v606_v4 }
  0xca   : > { %v623_v8 = vunpack.c.l.b16 %v616_v5 }
  0xcf   : > { %v608_v6 = vpop.f32.mrf.mxu0 }
  0xd0   : > { %v617_v7 = vpack.c.bf16 %v608_v6, %v608_v6 }
  0xd2   : > { %v624_v9 = vunpack.c.l.b16 %v617_v7 }
  0xd4   : > { %v625_v10 = vpack.c.b16 %v624_v9, %v623_v8 }
  0xd6   : > { %v630_v11 = vsel %vm590_vm0, %v625_v10, 0 }
  0xd7   : > { %v611_v12 = vpop.f32.mrf.mxu0  ;;  %639 = vmatpush.bf16.xpose.msra.mxu1 %v630_v11 }
  0xd8   : > { %v618_v14 = vpack.c.bf16 %v611_v12, %v611_v12 }
  0xda   : > { %v647_v16 = vunpack.c.l.b16 %v618_v14 }
  0xde   : > { %1099 = vmatmul.msk.bf16.vlgmr.msra.gmra.mxu1 %vm590_vm0, %v620_v13 }
  0xdf   : > { %v613_v15 = vpop.f32.mrf.mxu0  ;;  %771 = vmatpush.bf16.msrb.mxu1 %v1142_v53 }
  0xe0   : > { %v619_v17 = vpack.c.bf16 %v613_v15, %v613_v15 }
  0xe2   : > { %v648_v18 = vunpack.c.l.b16 %v619_v17 }
  0xe3   : > { %772 = vmatpush.bf16.msrb.mxu1 %v1141_v54 }
  0xe4   : > { %v649_v19 = vpack.c.b16 %v648_v18, %v647_v16 }
  0xe6   : > { %v651_v20 = vsel %vm590_vm0, %v649_v19, 0 }
  0xe7   : > { %660 = vmatpush.bf16.xpose.msra.mxu2 %v651_v20 }
  0xee   : > { %1100 = vmatmul.msk.bf16.vlgmr.msra.gmra.mxu2 %vm590_vm0, %v620_v13 }
  0xef   : > { %831 = vmatpush.bf16.msrb.mxu2 %v1146_v60 }
  0xf3   : > { %832 = vmatpush.bf16.msrb.mxu2 %v1145_v61 }
  0xf7   : > { %833 = vmatpush.bf16.msrb.mxu2 %v1144_v62 }
  0xfb   : > { %834 = vmatpush.bf16.msrb.mxu2 %v1143_v63 }
 0x15b   : > { %v641_v22 = vpop.f32.mrf.mxu1 }
 0x15c   : > { %v666_v23 = vmul.f32 0.17677669, %v641_v22 }
 0x15e   : > { %v676_v24 = vadd.f32 %v1253_v21, %v666_v23 }
 0x160   : > { %v679_v25 = vsel %vm678_vm1, %v676_v24, -inf }
 0x161   : > { %680 = vmax.xlane.f32.xlu0 %v679_v25 }
 0x163   : > { %v643_v26 = vpop.f32.mrf.mxu1 }
 0x171   : > { %v662_v28 = vpop.f32.mrf.mxu2 }
 0x172   : > { %v667_v29 = vmul.f32 0.17677669, %v662_v28 }
 0x174   : > { %v677_v30 = vadd.f32 %v1254_v27, %v667_v29 }
 0x176   : > { %v682_v31 = vsel %vm678_vm1, %v677_v30, -inf }
 0x177   : > { %683 = vmax.xlane.f32.xlu0 %v682_v31 }
 0x179   : > { %v664_v32 = vpop.f32.mrf.mxu2 }
 0x1d4   : > { %v681_v33 = vpop.xlane.xlu0 %680 }
 0x1d5   : > { %v685_v34 = vsub.f32 %v676_v24, %v681_v33 }
 0x1d7   : > { %v687_v35 = vmul.f32 1.442695, %v685_v34 }
 0x1d9   : > { %1257 = vpow2.f32 %v687_v35 }
 0x1df   : > { %v1258_v36 = vpop.eup %1257 }
 0x1e0   : > { %v691_v37 = vsel %vm678_vm1, %v1258_v36, 0.0 }
 0x1e1   : > { %692 = vadd.xlane.f32.xlu1 %v691_v37 }
 0x1ea   : > { %v684_v38 = vpop.xlane.xlu0 %683 }
 0x1eb   : > { %v686_v39 = vsub.f32 %v677_v30, %v684_v38 }
 0x1ed   : > { %v689_v40 = vmul.f32 1.442695, %v686_v39 }
 0x1ef   : > { %1259 = vpow2.f32 %v689_v40 }
 0x1f5   : > { %v1260_v41 = vpop.eup %1259 }
 0x1f6   : > { %v694_v42 = vsel %vm678_vm1, %v1260_v41, 0.0 }
 0x1f7   : > { %695 = vadd.xlane.f32.xlu2 %v694_v42 }
 0x1fa   : > { %703 = vrot.lane.b32.xlu1 %v625_v10, %s1547_s11  ;;  %v1256_v10 = vld [vmem:[%s553_s25] ss:$0 sm:$0xff] }
 0x20f   : > { %722 = vrot.lane.b32.xlu2 %v649_v19, %s1547_s11  ;;  %s844_s11 = scalar_lea.sflag [#allocation5], %s1758_s29 }
 0x254   : > { %v693_v43 = vpop.xlane.xlu1 %692 }
 0x255   : > { %1261 = vrcp.f32 %v693_v43 }
 0x25b   : > { %v1262_v44 = vpop.eup %1261 }
 0x25c   : > { %v699_v46 = vmul.f32 %v1262_v44, %v1258_v36 }
 0x25e   : > { %v701_v48 = vpack.c.bf16 %v699_v46, %v699_v46 }
 0x26a   : > { %v696_v45 = vpop.xlane.xlu2 %695 }
 0x26b   : > { %1263 = vrcp.f32 %v696_v45 }
 0x26c   : > { %v704_v47 = vpop.permute.xlu1 %703 }
 0x26d   : > { %716 = vmatpush.bf16.msra.mxu3 %v704_v47 }
 0x270   : > { %1101 = vmatmul.msk.bf16.vlgmr.msra.gmra.mxu3 %vm678_vm1, %v701_v48 }
 0x271   : > { %v1264_v50 = vpop.eup %1263 }
 0x272   : > { %v723_v49 = vpop.permute.xlu2 %722  ;;  %v700_v51 = vmul.f32 %v1264_v50, %v1260_v41 }
 0x273   : > { %735 = vmatpush.bf16.msrb.mxu3 %v723_v49 }
 0x274   : > { %v702_v52 = vpack.c.bf16 %v700_v51, %v700_v51 }
 0x280   : > { %1102 = vmatmul.msk.bf16.vlgmr.msrb.gmra.mxu3 %vm678_vm1, %v702_v52 }
 0x2f3   : > { %v718_v55 = vpop.f32.mrf.mxu3 }
 0x2fb   : > { %v720_v56 = vpop.f32.mrf.mxu3 }
 0x303   : > { %v737_v57 = vpop.f32.mrf.mxu3 }
 0x304   : > { %v741_v58 = vpack.c.bf16 %v737_v57, %v718_v55 }
 0x306   : > { %1111 = vmatmul.msk.bf16.vlgmr.msrb.gmra.mxu1 %vm590_vm0, %v741_v58 }
 0x30b   : > { %v739_v59 = vpop.f32.mrf.mxu3 }
 0x383   : > { %v774_v1 = vpop.f32.mrf.mxu1 }
 0x384   : > { %v775_v2 = vadd.f32 %v1255_v0, %v774_v1 }
 0x386   : > { %1265 = vtanh.f32 %v775_v2 }
 0x38b   : > { %v776_v3 = vpop.f32.mrf.mxu1 }
 0x38c   : > { %v1266_v4 = vpop.eup %1265  ;;  %v777_v5 = vadd.f32 %v1255_v0, %v776_v3 }
 0x38d   : > { %782 = vst.msk [vmem:[#allocation2] sm:$0xff] %vm781_vm2, %v1266_v4 }
 0x38e   : > { %1267 = vtanh.f32 %v777_v5 }
 0x394   : > { %v1268_v6 = vpop.eup %1267  ;;  %v784_v7 = vld [vmem:[#allocation2] sm:$0xff] }
 0x395   : > { %783 = vst.msk [vmem:[#allocation2 + $0x8] sm:$0xff] %vm781_vm2, %v1268_v6 }
 0x39c   : > { %v785_v8 = vld [vmem:[#allocation2 + $0x8] sm:$0xff] }
 0x39d   : > { %v786_v9 = vpack.c.bf16 %v785_v8, %v784_v7 }
 0x39f   : > { %1128 = vmatmul.msk.bf16.vlgmr.msrb.gmra.mxu2 %vm781_vm2, %v786_v9 }
 0x422   : > { %v836_v11 = vpop.f32.mrf.mxu2 }
 0x423   : > { %v837_v12 = vadd.f32 %v1256_v10, %v836_v11 }
 0x425   : > { %841 = vst [vmem:[%s542_s21] sm:$0xff] %v837_v12 }
 0x42a   : > { %v838_v13 = vpop.f32.mrf.mxu2 }
 0x42b   : > { %v839_v14 = vadd.f32 %v1256_v10, %v838_v13 }
 0x42d   : > { %842 = vst [vmem:[%s542_s21 + $0x8] sm:$0xff] %v839_v14 }
 0x42e   : > { %1476 = shalt.err (!%p1473_p13)
}
 0x42f   : > { %s1548_s29 = smov 128   ;;  %s1549_s10 = smov 8  }
 0x430   : > { %1164 = dma.vmem_to_hbm [thread:$0]  (%p1678_p3), %s860_s15, 256, %s862_s16, %s844_s11, %s1548_s29, %s1548_s29, %s1549_s10  }
 0x431 PF: > { %s1879_s20 = sld [smem:[#allocation19_spill]] }
 0x432   : > { %s1880_s25 = sld [smem:[#allocation17_spill]] }
 0x437   : > { %p1195_p0 = scmp.ge.s32.totalorder %s1879_s20, 2 }
 0x438   : > { %s876_s27 = sand.u32 1, %s1880_s25  }
 0x439   : > { %p1187_p5 = pnand %p1195_p0, %p1640_p6  ;;  %s877_s24 = scalar_lea.sflag [#allocation5], %s876_s27 }
 0x43b   : > { %p1188_p7 = pneg %p1187_p5 }
 0x43d   : > { %1514 = dma.done.wait (%p1188_p7), %s877_s24, 256  }
 0x43e   : > { %1516 = vsyncadd (%p1188_p7), %s877_s24, 4294967040  ;;  %s23_s10 = sadd.s32 1, %s1879_s20   ;;  %s1882_s19 = sld [smem:[#allocation18_spill]] }
 0x43f   : > { %p20_p2 = scmp.ge.s32.totalorder %s23_s10, 5   ;;  %s1883_s29 = sld [smem:[#allocation23_spill]] }
 0x440   : > { %s1884_s14 = sld [smem:[#allocation21_spill]]  ;;  %s1885_s27 = smov %s1523_s28 }
 0x441   : > { %s1887_s30 = smov %s1535_s9 }
 0x442   :  { %22 = sbr.rel (!%p20_p2) target bundleno = 10 (0xa), region = 149 }
 0x444   : > { %s1886_s28 = smov %s1882_s19 }
 0x446   : > { %s1888_s9 = smov %s1884_s14 }
 0x447   :  { %883 = vsyncpa [#allocation4], 1 }
 0x448   :  { %885 = vsyncpa [#allocation4 + $0x1], 1 }
 0x449   :  { %886 = vsyncpa [#allocation7], 1 }
 0x44a   :  { %887 = vsyncpa [#allocation5], 1 }
 0x44b   :  { %889 = vsyncpa [#allocation5 + $0x1], 1 }

</bundles_post_ra>
